<compile_context>
chip_gen: v5e
topology: v5e:2x2
jax: 0.10.0
libtpu: 0.0.40
codegen_flags: <defaults>
</compile_context>

<pallas_src>
import functools

import jax
import jax.numpy as jnp
from jax.experimental import pallas as pl
from jax.experimental.pallas import tpu as pltpu


def _round_up(x, m):
    return ((x + m - 1) // m) * m


def _num_tensorcores():
    """2 only on v7x (2 TCs/chip); v5e/v6e are single-TC, so don't split batch."""
    try:
        kind = jax.devices()[0].device_kind.lower()
    except Exception:
        return 1
    return 2 if "v7" in kind else 1


def _vmem_limit_bytes():
    """Generation-aware scoped-VMEM limit (leave headroom under physical VMEM)."""
    try:
        phys = int(pltpu.get_tpu_info().vmem_capacity_bytes)
    except Exception:
        phys = 64 << 20  # conservative (v7x-sized) fallback
    return max(32 << 20, min(int(phys * 3 // 4), 96 << 20))


def _pick_time_chunk(seq_len, b_blk, h_pad, wh_bytes, vmem_limit, max_tc):
    """Largest Tc whose (double-buffered) G/y blocks fit the VMEM budget."""
    fixed = 2 * wh_bytes                       # Wh (budgeted double-buffered)
    fixed += 2 * 4 * h_pad * 4                 # bias buffers (tiny)
    fixed += 8 * b_blk * h_pad * 4             # h0/c0 inputs + hT/cT outputs
    budget = vmem_limit - fixed - (4 << 20)    # scheduler / semaphore headroom
    per_step = b_blk * (4 * h_pad + h_pad) * 4 * 2   # G + y blocks, x2 buffers
    cap = max(1, budget // per_step)
    return int(max(1, min(cap, seq_len, max_tc)))


def _stack_gate_weights(params, H, H_pad):
    """Gate-stacked [i, f, o, g] weights, lane-padded to H_pad per gate.

    The [i, f, o, g] order puts the three sigmoid gates in one contiguous
    (B, 3*H_pad) lane slice (single sigmoid call) and tanh on the last slice.
    """
    order = ("i", "f", "o", "g")

    def pad_cols(w):                                        # (rows, H) -> (rows, H_pad)
        return jnp.pad(w, ((0, 0), (0, H_pad - H)))

    wx = jnp.concatenate(
        [pad_cols(params["w_i" + g].T) for g in order], axis=1)   # (I, 4*H_pad)
    wh = jnp.concatenate(
        [jnp.pad(params["w_h" + g].T, ((0, H_pad - H), (0, H_pad - H)))
         for g in order], axis=1)                                 # (H_pad, 4*H_pad)
    bias = jnp.concatenate(
        [jnp.pad(params["b_i" + g] + params["b_h" + g], (0, H_pad - H))
         for g in order], axis=0)                                 # (4*H_pad,)
    return wx, wh, bias


def _lstm_recurrence_kernel(g_ref, bias_ref, h0_ref, c0_ref, wh_ref,
                            y_ref, hT_ref, cT_ref,
                            *, seq_len, time_chunk, unroll):
    """One (batch_block, time_chunk) grid step of the LSTM recurrence.

    g_ref   : (Tc, B_blk, 4*Hp)  precomputed x@Wx for this chunk
    bias_ref: (1, 4*Hp)          combined input+hidden bias (grid-invariant)
    wh_ref  : (Hp, 4*Hp)         recurrent weights (grid-invariant)
    y_ref   : (Tc, B_blk, Hp)    per-step hidden outputs
    hT_ref/cT_ref: (B_blk, Hp)   running state (same block every time step ->
                                 VMEM-resident accumulator; final value = h_T/c_T)
    """
    Hp = hT_ref.shape[-1]
    Tc = g_ref.shape[0]

    # Initialize the running state at the first time chunk of this batch block.
    @pl.when(pl.program_id(1) == 0)
    def _():
        hT_ref[...] = h0_ref[...]
        cT_ref[...] = c0_ref[...]

    wh = wh_ref[...]       # possibly bf16; matmul accumulates in f32
    bias = bias_ref[...]   # (1, 4*Hp); broadcast over batch rows per step

    needs_mask = (seq_len % time_chunk) != 0   # static (trace-time) decision
    t_base = pl.program_id(1) * time_chunk

    def step(t, carry):
        h, c = carry
        gates = (g_ref[t] + bias
                 + jnp.dot(h.astype(wh.dtype), wh,
                           preferred_element_type=jnp.float32))
        # [i, f, o] share one contiguous sigmoid slice; g is the tanh slice.
        sig = jax.nn.sigmoid(gates[:, :3 * Hp])
        i_t = sig[:, 0 * Hp:1 * Hp]
        f_t = sig[:, 1 * Hp:2 * Hp]
        o_t = sig[:, 2 * Hp:3 * Hp]
        g_t = jnp.tanh(gates[:, 3 * Hp:4 * Hp])
        c_new = f_t * c + i_t * g_t
        h_new = o_t * jnp.tanh(c_new)
        if needs_mask:
            # Tail steps past the true sequence length: hold the state.
            valid = (t_base + t) < seq_len
            h_new = jnp.where(valid, h_new, h)
            c_new = jnp.where(valid, c_new, c)
        y_ref[t] = h_new
        return h_new, c_new

    h, c = jax.lax.fori_loop(0, Tc, step, (hT_ref[...], cT_ref[...]),
                             unroll=unroll)
    hT_ref[...] = h
    cT_ref[...] = c


def lstm_forward(inputs, hidden_states, params, *,
                 weights_dtype=jnp.float32, max_time_chunk=256):
    """inputs: (B, S, I) f32; hidden_states: (h, c) each (1, B, H) f32."""
    h0, c0 = hidden_states
    B, S, I = inputs.shape
    H = h0.shape[-1]

    B_pad = _round_up(B, 8)     # f32 sublane alignment
    H_pad = _round_up(H, 128)   # lane alignment (lane-dense slices & stores)

    wx, wh, bias = _stack_gate_weights(params, H, H_pad)
    wh = wh.astype(weights_dtype)

    # Batch split only when >= 2 TensorCores (v7x); single-TC chips keep the
    # full padded batch in one block (largest matmul M, fewest grid steps).
    num_tc = _num_tensorcores()
    n_b = 2 if (num_tc >= 2 and B_pad % 16 == 0) else 1
    B_blk = B_pad // n_b

    # Generation-aware time chunking: amortize grid overhead, stay in VMEM.
    vmem_limit = _vmem_limit_bytes()
    wh_bytes = H_pad * 4 * H_pad * jnp.dtype(weights_dtype).itemsize
    Tc = _pick_time_chunk(S, B_blk, H_pad, wh_bytes, vmem_limit, max_time_chunk)
    n_t = pl.cdiv(S, Tc)
    S_pad = n_t * Tc
    unroll = min(Tc, 8)   # bounded unroll: DMA amortized by Tc, codegen by 8

    # Pad the SMALL input x (batch + seq) BEFORE the big projection, so the
    # dominant (S_pad, B_pad, 4*H_pad) gate stream is produced at its final
    # shape by one fused matmul+transpose — no extra HBM passes over it.
    x_p = inputs
    if B_pad != B or S_pad != S:
        x_p = jnp.pad(inputs, ((0, B_pad - B), (0, S_pad - S), (0, 0)))
    g_stream = jnp.einsum("bsi,ij->sbj", x_p, wx,
                          preferred_element_type=jnp.float32)   # (S_pad, B_pad, 4*H_pad)

    h0p = jnp.pad(h0[0].astype(jnp.float32), ((0, B_pad - B), (0, H_pad - H)))
    c0p = jnp.pad(c0[0].astype(jnp.float32), ((0, B_pad - B), (0, H_pad - H)))
    bias2d = bias[None, :]                                       # (1, 4*H_pad)

    grid_spec = pltpu.PrefetchScalarGridSpec(
        num_scalar_prefetch=0,
        grid=(n_b, n_t),
        in_specs=[
            pl.BlockSpec((Tc, B_blk, 4 * H_pad), lambda b, t: (t, b, 0)),  # G
            pl.BlockSpec((1, 4 * H_pad), lambda b, t: (0, 0)),             # bias
            pl.BlockSpec((B_blk, H_pad), lambda b, t: (b, 0)),             # h0
            pl.BlockSpec((B_blk, H_pad), lambda b, t: (b, 0)),             # c0
            pl.BlockSpec((H_pad, 4 * H_pad), lambda b, t: (0, 0)),         # Wh
        ],
        out_specs=[
            pl.BlockSpec((Tc, B_blk, H_pad), lambda b, t: (t, b, 0)),      # y
            pl.BlockSpec((B_blk, H_pad), lambda b, t: (b, 0)),             # h_T
            pl.BlockSpec((B_blk, H_pad), lambda b, t: (b, 0)),             # c_T
        ],
    )

    kernel = functools.partial(_lstm_recurrence_kernel,
                               seq_len=S, time_chunk=Tc, unroll=unroll)

    y_pad, h_T, c_T = pl.pallas_call(
        kernel,
        out_shape=(
            jax.ShapeDtypeStruct((S_pad, B_pad, H_pad), jnp.float32),
            jax.ShapeDtypeStruct((B_pad, H_pad), jnp.float32),
            jax.ShapeDtypeStruct((B_pad, H_pad), jnp.float32),
        ),
        grid_spec=grid_spec,
        compiler_params=pltpu.CompilerParams(
            # batch blocks are independent; the time recurrence is serial
            dimension_semantics=("parallel", "arbitrary"),
            vmem_limit_bytes=int(vmem_limit)),
    )(g_stream, bias2d, h0p, c0p, wh)

    # TODO(synk): downstream consumers that accept time-major (S, B, H) could
    # skip this unpad+transpose pass over y entirely.
    y = jnp.transpose(y_pad[:S, :B, :H], (1, 0, 2))              # (B, S, H)
    return y, (h_T[:B, :H][None, ...], c_T[:B, :H][None, ...])


def _reference_lstm(inputs, hidden_states, params):
    """Pure-JAX reference mirroring the PyTorch loop."""
    h, c = hidden_states[0][0], hidden_states[1][0]

    def step(carry, x_t):
        h, c = carry
        i_t = jax.nn.sigmoid(x_t @ params["w_ii"].T + params["b_ii"]
                             + h @ params["w_hi"].T + params["b_hi"])
        f_t = jax.nn.sigmoid(x_t @ params["w_if"].T + params["b_if"]
                             + h @ params["w_hf"].T + params["b_hf"])
        g_t = jnp.tanh(x_t @ params["w_ig"].T + params["b_ig"]
                       + h @ params["w_hg"].T + params["b_hg"])
        o_t = jax.nn.sigmoid(x_t @ params["w_io"].T + params["b_io"]
                             + h @ params["w_ho"].T + params["b_ho"])
        c = f_t * c + i_t * g_t
        h = o_t * jnp.tanh(c)
        return (h, c), h

    (h, c), ys = jax.lax.scan(step, (h, c), jnp.transpose(inputs, (1, 0, 2)))
    return jnp.transpose(ys, (1, 0, 2)), (h[None], c[None])


def init_params(key, input_size, hidden_size):
    bound = (1.0 / hidden_size) ** 0.5
    shapes = {
        "w_ii": (hidden_size, input_size), "w_if": (hidden_size, input_size),
        "w_ig": (hidden_size, input_size), "w_io": (hidden_size, input_size),
        "b_ii": (hidden_size,), "b_if": (hidden_size,),
        "b_ig": (hidden_size,), "b_io": (hidden_size,),
        "w_hi": (hidden_size, hidden_size), "w_hf": (hidden_size, hidden_size),
        "w_hg": (hidden_size, hidden_size), "w_ho": (hidden_size, hidden_size),
        "b_hi": (hidden_size,), "b_hf": (hidden_size,),
        "b_hg": (hidden_size,), "b_ho": (hidden_size,),
    }
    params = {}
    for name, shape in sorted(shapes.items()):
        key, sub = jax.random.split(key)
        params[name] = jax.random.uniform(
            sub, shape, dtype=jnp.float32, minval=-bound, maxval=bound)
    return params


if __name__ == "__main__":
    B, S, I, H = 2, 8, 16, 32

    key = jax.random.PRNGKey(0)
    k_p, k_x, k_h, k_c = jax.random.split(key, 4)
    params = init_params(k_p, I, H)
    x = jax.random.normal(k_x, (B, S, I), dtype=jnp.float32)
    h0 = jax.random.normal(k_h, (1, B, H), dtype=jnp.float32)
    c0 = jax.random.normal(k_c, (1, B, H), dtype=jnp.float32)

    y_ref, (h_ref, c_ref) = _reference_lstm(x, (h0, c0), params)

    # f32 recurrent weights: tight match against the PyTorch-style reference.
    fwd = jax.jit(functools.partial(lstm_forward, params=params))
    y, (h_T, c_T) = fwd(x, (h0, c0))
    jax.block_until_ready((y, h_T, c_T))
    assert y.shape == (B, S, H)
    assert h_T.shape == (1, B, H) and c_T.shape == (1, B, H)
    assert jnp.allclose(y, y_ref, atol=1e-5, rtol=1e-5)
    assert jnp.allclose(h_T, h_ref, atol=1e-5, rtol=1e-5)
    assert jnp.allclose(c_T, c_ref, atol=1e-5, rtol=1e-5)

    # Masked-tail path: force Tc=3 so S=8 needs a padded, masked last chunk.
    fwd_tail = jax.jit(functools.partial(lstm_forward, params=params,
                                         max_time_chunk=3))
    y_t, (h_t, c_t) = fwd_tail(x, (h0, c0))
    jax.block_until_ready((y_t, h_t, c_t))
    assert jnp.allclose(y_t, y_ref, atol=1e-5, rtol=1e-5)
    assert jnp.allclose(h_t, h_ref, atol=1e-5, rtol=1e-5)
    assert jnp.allclose(c_t, c_ref, atol=1e-5, rtol=1e-5)

    # bf16 recurrent weights (MXU-native), f32 accumulation.  NOTE: h is recast
    # to bf16 each step, so rounding error compounds with sequence length; the
    # loose tolerance below is only calibrated for short sequences.
    fwd_bf16 = jax.jit(functools.partial(
        lstm_forward, params=params, weights_dtype=jnp.bfloat16))
    y_b, (h_b, c_b) = fwd_bf16(x, (h0, c0))
    jax.block_until_ready((y_b, h_b, c_b))
    assert jnp.allclose(y_b, y_ref, atol=1e-1, rtol=1e-1)
    assert jnp.allclose(h_b, h_ref, atol=1e-1, rtol=1e-1)

    print("KERNEL_OK")
</pallas_src>

<mosaic_0001>
module attributes {stable_mosaic.version = 11 : i64} {
  func.func @_lstm_recurrence_kernel(%arg0: i32, %arg1: i32, %arg2: memref<8x8x512xf32, #tpu.memory_space<vmem>>, %arg3: memref<1x512xf32, #tpu.memory_space<vmem>>, %arg4: memref<8x128xf32, #tpu.memory_space<vmem>>, %arg5: memref<8x128xf32, #tpu.memory_space<vmem>>, %arg6: memref<128x512xf32, #tpu.memory_space<vmem>>, %arg7: memref<8x8x128xf32, #tpu.memory_space<vmem>>, %arg8: memref<8x128xf32, #tpu.memory_space<vmem>>, %arg9: memref<8x128xf32, #tpu.memory_space<vmem>>) attributes {dimension_semantics = [#tpu.dimension_semantics<parallel>, #tpu.dimension_semantics<arbitrary>], iteration_bounds = array<i64: 1, 1>, scalar_prefetch = 0 : i64, scratch_operands = 0 : i64, tpu.core_type = #tpu.core_type<tc>, window_params = [{transform_indices = @transform_0, window_bounds = array<i64: 8, 8, 512>}, {pipeline_mode = #tpu.pipeline_mode<synchronous>, transform_indices = @transform_1, window_bounds = array<i64: 1, 512>}, {transform_indices = @transform_2, window_bounds = array<i64: 8, 128>}, {transform_indices = @transform_3, window_bounds = array<i64: 8, 128>}, {pipeline_mode = #tpu.pipeline_mode<synchronous>, transform_indices = @transform_4, window_bounds = array<i64: 128, 512>}, {transform_indices = @transform_5, window_bounds = array<i64: 8, 8, 128>}, {transform_indices = @transform_6, window_bounds = array<i64: 8, 128>}, {transform_indices = @transform_7, window_bounds = array<i64: 8, 128>}]} {
    %c0_i32 = arith.constant 0 : i32
    %0 = arith.cmpi eq, %arg1, %c0_i32 : i32
    %1 = arith.extui %0 : i1 to i32
    %c0_i32_0 = arith.constant 0 : i32
    %2 = arith.cmpi ne, %1, %c0_i32_0 : i32
    scf.if %2 {
      %c0_60 = arith.constant 0 : index
      %c0_61 = arith.constant 0 : index
      %225 = vector.load %arg4[%c0_60, %c0_61] : memref<8x128xf32, #tpu.memory_space<vmem>>, vector<8x128xf32>
      %c0_62 = arith.constant 0 : index
      %c0_63 = arith.constant 0 : index
      %226 = vector.load %arg8[%c0_62, %c0_63] : memref<8x128xf32, #tpu.memory_space<vmem>>, vector<8x128xf32>
      tpu.vector_store %arg8[%c0_62, %c0_63], %225 {strides = array<i32>} : memref<8x128xf32, #tpu.memory_space<vmem>>, vector<8x128xf32>,
      %c0_64 = arith.constant 0 : index
      %c0_65 = arith.constant 0 : index
      %227 = vector.load %arg5[%c0_64, %c0_65] : memref<8x128xf32, #tpu.memory_space<vmem>>, vector<8x128xf32>
      %c0_66 = arith.constant 0 : index
      %c0_67 = arith.constant 0 : index
      %228 = vector.load %arg9[%c0_66, %c0_67] : memref<8x128xf32, #tpu.memory_space<vmem>>, vector<8x128xf32>
      tpu.vector_store %arg9[%c0_66, %c0_67], %227 {strides = array<i32>} : memref<8x128xf32, #tpu.memory_space<vmem>>, vector<8x128xf32>,
    } else {
    }
    %c0 = arith.constant 0 : index
    %c0_1 = arith.constant 0 : index
    %3 = vector.load %arg6[%c0, %c0_1] : memref<128x512xf32, #tpu.memory_space<vmem>>, vector<128x512xf32>
    %c0_2 = arith.constant 0 : index
    %c0_3 = arith.constant 0 : index
    %4 = vector.load %arg3[%c0_2, %c0_3] : memref<1x512xf32, #tpu.memory_space<vmem>>, vector<1x512xf32>
    %c0_4 = arith.constant 0 : index
    %c0_5 = arith.constant 0 : index
    %5 = vector.load %arg8[%c0_4, %c0_5] : memref<8x128xf32, #tpu.memory_space<vmem>>, vector<8x128xf32>
    %c0_6 = arith.constant 0 : index
    %c0_7 = arith.constant 0 : index
    %6 = vector.load %arg9[%c0_6, %c0_7] : memref<8x128xf32, #tpu.memory_space<vmem>>, vector<8x128xf32>
    %c0_i32_8 = arith.constant 0 : i32
    %7 = arith.index_cast %c0_i32_8 : i32 to index
    %c0_9 = arith.constant 0 : index
    %c0_10 = arith.constant 0 : index
    %8 = vector.load %arg2[%7, %c0_9, %c0_10] : memref<8x8x512xf32, #tpu.memory_space<vmem>>, vector<1x8x512xf32>
    %9 = vector.shape_cast %8 : vector<1x8x512xf32> to vector<8x512xf32>
    %10 = vector.broadcast %4 : vector<1x512xf32> to vector<8x512xf32>
    %11 = arith.addf %9, %10 : vector<8x512xf32>
    %cst = arith.constant dense<0.000000e+00> : vector<8x512xf32>
    %12 = tpu.matmul %5, %3, %cst {dimension_numbers = #tpu.dot_dimension_numbers<[1], [0], [0], [1], [0, 0, 1, 1], [], []>} : vector<8x128xf32>, vector<128x512xf32>, vector<8x512xf32> -> vector<8x512xf32>
    %13 = arith.addf %11, %12 : vector<8x512xf32>
    %14 = vector.extract_strided_slice %13 {offsets = [0, 0], sizes = [8, 384], strides = [1, 1]} : vector<8x512xf32> to vector<8x384xf32>
    %15 = arith.negf %14 : vector<8x384xf32>
    %16 = math.exp %15 : vector<8x384xf32>
    %cst_11 = arith.constant 1.000000e+00 : f32
    %17 = vector.broadcast %cst_11 : f32 to vector<8x384xf32>
    %18 = arith.addf %17, %16 : vector<8x384xf32>
    %19 = arith.divf %17, %18 : vector<8x384xf32>
    %20 = vector.extract_strided_slice %19 {offsets = [0, 0], sizes = [8, 128], strides = [1, 1]} : vector<8x384xf32> to vector<8x128xf32>
    %21 = vector.extract_strided_slice %19 {offsets = [0, 128], sizes = [8, 128], strides = [1, 1]} : vector<8x384xf32> to vector<8x128xf32>
    %22 = vector.extract_strided_slice %19 {offsets = [0, 256], sizes = [8, 128], strides = [1, 1]} : vector<8x384xf32> to vector<8x128xf32>
    %23 = vector.extract_strided_slice %13 {offsets = [0, 384], sizes = [8, 128], strides = [1, 1]} : vector<8x512xf32> to vector<8x128xf32>
    %24 = math.tanh %23 : vector<8x128xf32>
    %25 = arith.mulf %21, %6 : vector<8x128xf32>
    %26 = arith.mulf %20, %24 : vector<8x128xf32>
    %27 = arith.addf %25, %26 : vector<8x128xf32>
    %28 = math.tanh %27 : vector<8x128xf32>
    %29 = arith.mulf %22, %28 : vector<8x128xf32>
    %30 = arith.index_cast %c0_i32_8 : i32 to index
    %c0_12 = arith.constant 0 : index
    %c0_13 = arith.constant 0 : index
    %31 = vector.load %arg7[%30, %c0_12, %c0_13] : memref<8x8x128xf32, #tpu.memory_space<vmem>>, vector<1x8x128xf32>
    %32 = vector.shape_cast %31 : vector<1x8x128xf32> to vector<8x128xf32>
    %33 = vector.shape_cast %29 : vector<8x128xf32> to vector<1x8x128xf32>
    tpu.vector_store %arg7[%30, %c0_12, %c0_13], %33 {strides = array<i32>} : memref<8x8x128xf32, #tpu.memory_space<vmem>>, vector<1x8x128xf32>,
    %c1_i32 = arith.constant 1 : i32
    %34 = arith.index_cast %c1_i32 : i32 to index
    %c0_14 = arith.constant 0 : index
    %c0_15 = arith.constant 0 : index
    %35 = vector.load %arg2[%34, %c0_14, %c0_15] : memref<8x8x512xf32, #tpu.memory_space<vmem>>, vector<1x8x512xf32>
    %36 = vector.shape_cast %35 : vector<1x8x512xf32> to vector<8x512xf32>
    %37 = vector.broadcast %4 : vector<1x512xf32> to vector<8x512xf32>
    %38 = arith.addf %36, %37 : vector<8x512xf32>
    %cst_16 = arith.constant dense<0.000000e+00> : vector<8x512xf32>
    %39 = tpu.matmul %29, %3, %cst_16 {dimension_numbers = #tpu.dot_dimension_numbers<[1], [0], [0], [1], [0, 0, 1, 1], [], []>} : vector<8x128xf32>, vector<128x512xf32>, vector<8x512xf32> -> vector<8x512xf32>
    %40 = arith.addf %38, %39 : vector<8x512xf32>
    %41 = vector.extract_strided_slice %40 {offsets = [0, 0], sizes = [8, 384], strides = [1, 1]} : vector<8x512xf32> to vector<8x384xf32>
    %42 = arith.negf %41 : vector<8x384xf32>
    %43 = math.exp %42 : vector<8x384xf32>
    %cst_17 = arith.constant 1.000000e+00 : f32
    %44 = vector.broadcast %cst_17 : f32 to vector<8x384xf32>
    %45 = arith.addf %44, %43 : vector<8x384xf32>
    %46 = arith.divf %44, %45 : vector<8x384xf32>
    %47 = vector.extract_strided_slice %46 {offsets = [0, 0], sizes = [8, 128], strides = [1, 1]} : vector<8x384xf32> to vector<8x128xf32>
    %48 = vector.extract_strided_slice %46 {offsets = [0, 128], sizes = [8, 128], strides = [1, 1]} : vector<8x384xf32> to vector<8x128xf32>
    %49 = vector.extract_strided_slice %46 {offsets = [0, 256], sizes = [8, 128], strides = [1, 1]} : vector<8x384xf32> to vector<8x128xf32>
    %50 = vector.extract_strided_slice %40 {offsets = [0, 384], sizes = [8, 128], strides = [1, 1]} : vector<8x512xf32> to vector<8x128xf32>
    %51 = math.tanh %50 : vector<8x128xf32>
    %52 = arith.mulf %48, %27 : vector<8x128xf32>
    %53 = arith.mulf %47, %51 : vector<8x128xf32>
    %54 = arith.addf %52, %53 : vector<8x128xf32>
    %55 = math.tanh %54 : vector<8x128xf32>
    %56 = arith.mulf %49, %55 : vector<8x128xf32>
    %57 = arith.index_cast %c1_i32 : i32 to index
    %c0_18 = arith.constant 0 : index
    %c0_19 = arith.constant 0 : index
    %58 = vector.load %arg7[%57, %c0_18, %c0_19] : memref<8x8x128xf32, #tpu.memory_space<vmem>>, vector<1x8x128xf32>
    %59 = vector.shape_cast %58 : vector<1x8x128xf32> to vector<8x128xf32>
    %60 = vector.shape_cast %56 : vector<8x128xf32> to vector<1x8x128xf32>
    tpu.vector_store %arg7[%57, %c0_18, %c0_19], %60 {strides = array<i32>} : memref<8x8x128xf32, #tpu.memory_space<vmem>>, vector<1x8x128xf32>,
    %c2_i32 = arith.constant 2 : i32
    %61 = arith.index_cast %c2_i32 : i32 to index
    %c0_20 = arith.constant 0 : index
    %c0_21 = arith.constant 0 : index
    %62 = vector.load %arg2[%61, %c0_20, %c0_21] : memref<8x8x512xf32, #tpu.memory_space<vmem>>, vector<1x8x512xf32>
    %63 = vector.shape_cast %62 : vector<1x8x512xf32> to vector<8x512xf32>
    %64 = vector.broadcast %4 : vector<1x512xf32> to vector<8x512xf32>
    %65 = arith.addf %63, %64 : vector<8x512xf32>
    %cst_22 = arith.constant dense<0.000000e+00> : vector<8x512xf32>
    %66 = tpu.matmul %56, %3, %cst_22 {dimension_numbers = #tpu.dot_dimension_numbers<[1], [0], [0], [1], [0, 0, 1, 1], [], []>} : vector<8x128xf32>, vector<128x512xf32>, vector<8x512xf32> -> vector<8x512xf32>
    %67 = arith.addf %65, %66 : vector<8x512xf32>
    %68 = vector.extract_strided_slice %67 {offsets = [0, 0], sizes = [8, 384], strides = [1, 1]} : vector<8x512xf32> to vector<8x384xf32>
    %69 = arith.negf %68 : vector<8x384xf32>
    %70 = math.exp %69 : vector<8x384xf32>
    %cst_23 = arith.constant 1.000000e+00 : f32
    %71 = vector.broadcast %cst_23 : f32 to vector<8x384xf32>
    %72 = arith.addf %71, %70 : vector<8x384xf32>
    %73 = arith.divf %71, %72 : vector<8x384xf32>
    %74 = vector.extract_strided_slice %73 {offsets = [0, 0], sizes = [8, 128], strides = [1, 1]} : vector<8x384xf32> to vector<8x128xf32>
    %75 = vector.extract_strided_slice %73 {offsets = [0, 128], sizes = [8, 128], strides = [1, 1]} : vector<8x384xf32> to vector<8x128xf32>
    %76 = vector.extract_strided_slice %73 {offsets = [0, 256], sizes = [8, 128], strides = [1, 1]} : vector<8x384xf32> to vector<8x128xf32>
    %77 = vector.extract_strided_slice %67 {offsets = [0, 384], sizes = [8, 128], strides = [1, 1]} : vector<8x512xf32> to vector<8x128xf32>
    %78 = math.tanh %77 : vector<8x128xf32>
    %79 = arith.mulf %75, %54 : vector<8x128xf32>
    %80 = arith.mulf %74, %78 : vector<8x128xf32>
    %81 = arith.addf %79, %80 : vector<8x128xf32>
    %82 = math.tanh %81 : vector<8x128xf32>
    %83 = arith.mulf %76, %82 : vector<8x128xf32>
    %84 = arith.index_cast %c2_i32 : i32 to index
    %c0_24 = arith.constant 0 : index
    %c0_25 = arith.constant 0 : index
    %85 = vector.load %arg7[%84, %c0_24, %c0_25] : memref<8x8x128xf32, #tpu.memory_space<vmem>>, vector<1x8x128xf32>
    %86 = vector.shape_cast %85 : vector<1x8x128xf32> to vector<8x128xf32>
    %87 = vector.shape_cast %83 : vector<8x128xf32> to vector<1x8x128xf32>
    tpu.vector_store %arg7[%84, %c0_24, %c0_25], %87 {strides = array<i32>} : memref<8x8x128xf32, #tpu.memory_space<vmem>>, vector<1x8x128xf32>,
    %c3_i32 = arith.constant 3 : i32
    %88 = arith.index_cast %c3_i32 : i32 to index
    %c0_26 = arith.constant 0 : index
    %c0_27 = arith.constant 0 : index
    %89 = vector.load %arg2[%88, %c0_26, %c0_27] : memref<8x8x512xf32, #tpu.memory_space<vmem>>, vector<1x8x512xf32>
    %90 = vector.shape_cast %89 : vector<1x8x512xf32> to vector<8x512xf32>
    %91 = vector.broadcast %4 : vector<1x512xf32> to vector<8x512xf32>
    %92 = arith.addf %90, %91 : vector<8x512xf32>
    %cst_28 = arith.constant dense<0.000000e+00> : vector<8x512xf32>
    %93 = tpu.matmul %83, %3, %cst_28 {dimension_numbers = #tpu.dot_dimension_numbers<[1], [0], [0], [1], [0, 0, 1, 1], [], []>} : vector<8x128xf32>, vector<128x512xf32>, vector<8x512xf32> -> vector<8x512xf32>
    %94 = arith.addf %92, %93 : vector<8x512xf32>
    %95 = vector.extract_strided_slice %94 {offsets = [0, 0], sizes = [8, 384], strides = [1, 1]} : vector<8x512xf32> to vector<8x384xf32>
    %96 = arith.negf %95 : vector<8x384xf32>
    %97 = math.exp %96 : vector<8x384xf32>
    %cst_29 = arith.constant 1.000000e+00 : f32
    %98 = vector.broadcast %cst_29 : f32 to vector<8x384xf32>
    %99 = arith.addf %98, %97 : vector<8x384xf32>
    %100 = arith.divf %98, %99 : vector<8x384xf32>
    %101 = vector.extract_strided_slice %100 {offsets = [0, 0], sizes = [8, 128], strides = [1, 1]} : vector<8x384xf32> to vector<8x128xf32>
    %102 = vector.extract_strided_slice %100 {offsets = [0, 128], sizes = [8, 128], strides = [1, 1]} : vector<8x384xf32> to vector<8x128xf32>
    %103 = vector.extract_strided_slice %100 {offsets = [0, 256], sizes = [8, 128], strides = [1, 1]} : vector<8x384xf32> to vector<8x128xf32>
    %104 = vector.extract_strided_slice %94 {offsets = [0, 384], sizes = [8, 128], strides = [1, 1]} : vector<8x512xf32> to vector<8x128xf32>
    %105 = math.tanh %104 : vector<8x128xf32>
    %106 = arith.mulf %102, %81 : vector<8x128xf32>
    %107 = arith.mulf %101, %105 : vector<8x128xf32>
    %108 = arith.addf %106, %107 : vector<8x128xf32>
    %109 = math.tanh %108 : vector<8x128xf32>
    %110 = arith.mulf %103, %109 : vector<8x128xf32>
    %111 = arith.index_cast %c3_i32 : i32 to index
    %c0_30 = arith.constant 0 : index
    %c0_31 = arith.constant 0 : index
    %112 = vector.load %arg7[%111, %c0_30, %c0_31] : memref<8x8x128xf32, #tpu.memory_space<vmem>>, vector<1x8x128xf32>
    %113 = vector.shape_cast %112 : vector<1x8x128xf32> to vector<8x128xf32>
    %114 = vector.shape_cast %110 : vector<8x128xf32> to vector<1x8x128xf32>
    tpu.vector_store %arg7[%111, %c0_30, %c0_31], %114 {strides = array<i32>} : memref<8x8x128xf32, #tpu.memory_space<vmem>>, vector<1x8x128xf32>,
    %c4_i32 = arith.constant 4 : i32
    %115 = arith.index_cast %c4_i32 : i32 to index
    %c0_32 = arith.constant 0 : index
    %c0_33 = arith.constant 0 : index
    %116 = vector.load %arg2[%115, %c0_32, %c0_33] : memref<8x8x512xf32, #tpu.memory_space<vmem>>, vector<1x8x512xf32>
    %117 = vector.shape_cast %116 : vector<1x8x512xf32> to vector<8x512xf32>
    %118 = vector.broadcast %4 : vector<1x512xf32> to vector<8x512xf32>
    %119 = arith.addf %117, %118 : vector<8x512xf32>
    %cst_34 = arith.constant dense<0.000000e+00> : vector<8x512xf32>
    %120 = tpu.matmul %110, %3, %cst_34 {dimension_numbers = #tpu.dot_dimension_numbers<[1], [0], [0], [1], [0, 0, 1, 1], [], []>} : vector<8x128xf32>, vector<128x512xf32>, vector<8x512xf32> -> vector<8x512xf32>
    %121 = arith.addf %119, %120 : vector<8x512xf32>
    %122 = vector.extract_strided_slice %121 {offsets = [0, 0], sizes = [8, 384], strides = [1, 1]} : vector<8x512xf32> to vector<8x384xf32>
    %123 = arith.negf %122 : vector<8x384xf32>
    %124 = math.exp %123 : vector<8x384xf32>
    %cst_35 = arith.constant 1.000000e+00 : f32
    %125 = vector.broadcast %cst_35 : f32 to vector<8x384xf32>
    %126 = arith.addf %125, %124 : vector<8x384xf32>
    %127 = arith.divf %125, %126 : vector<8x384xf32>
    %128 = vector.extract_strided_slice %127 {offsets = [0, 0], sizes = [8, 128], strides = [1, 1]} : vector<8x384xf32> to vector<8x128xf32>
    %129 = vector.extract_strided_slice %127 {offsets = [0, 128], sizes = [8, 128], strides = [1, 1]} : vector<8x384xf32> to vector<8x128xf32>
    %130 = vector.extract_strided_slice %127 {offsets = [0, 256], sizes = [8, 128], strides = [1, 1]} : vector<8x384xf32> to vector<8x128xf32>
    %131 = vector.extract_strided_slice %121 {offsets = [0, 384], sizes = [8, 128], strides = [1, 1]} : vector<8x512xf32> to vector<8x128xf32>
    %132 = math.tanh %131 : vector<8x128xf32>
    %133 = arith.mulf %129, %108 : vector<8x128xf32>
    %134 = arith.mulf %128, %132 : vector<8x128xf32>
    %135 = arith.addf %133, %134 : vector<8x128xf32>
    %136 = math.tanh %135 : vector<8x128xf32>
    %137 = arith.mulf %130, %136 : vector<8x128xf32>
    %138 = arith.index_cast %c4_i32 : i32 to index
    %c0_36 = arith.constant 0 : index
    %c0_37 = arith.constant 0 : index
    %139 = vector.load %arg7[%138, %c0_36, %c0_37] : memref<8x8x128xf32, #tpu.memory_space<vmem>>, vector<1x8x128xf32>
    %140 = vector.shape_cast %139 : vector<1x8x128xf32> to vector<8x128xf32>
    %141 = vector.shape_cast %137 : vector<8x128xf32> to vector<1x8x128xf32>
    tpu.vector_store %arg7[%138, %c0_36, %c0_37], %141 {strides = array<i32>} : memref<8x8x128xf32, #tpu.memory_space<vmem>>, vector<1x8x128xf32>,
    %c5_i32 = arith.constant 5 : i32
    %142 = arith.index_cast %c5_i32 : i32 to index
    %c0_38 = arith.constant 0 : index
    %c0_39 = arith.constant 0 : index
    %143 = vector.load %arg2[%142, %c0_38, %c0_39] : memref<8x8x512xf32, #tpu.memory_space<vmem>>, vector<1x8x512xf32>
    %144 = vector.shape_cast %143 : vector<1x8x512xf32> to vector<8x512xf32>
    %145 = vector.broadcast %4 : vector<1x512xf32> to vector<8x512xf32>
    %146 = arith.addf %144, %145 : vector<8x512xf32>
    %cst_40 = arith.constant dense<0.000000e+00> : vector<8x512xf32>
    %147 = tpu.matmul %137, %3, %cst_40 {dimension_numbers = #tpu.dot_dimension_numbers<[1], [0], [0], [1], [0, 0, 1, 1], [], []>} : vector<8x128xf32>, vector<128x512xf32>, vector<8x512xf32> -> vector<8x512xf32>
    %148 = arith.addf %146, %147 : vector<8x512xf32>
    %149 = vector.extract_strided_slice %148 {offsets = [0, 0], sizes = [8, 384], strides = [1, 1]} : vector<8x512xf32> to vector<8x384xf32>
    %150 = arith.negf %149 : vector<8x384xf32>
    %151 = math.exp %150 : vector<8x384xf32>
    %cst_41 = arith.constant 1.000000e+00 : f32
    %152 = vector.broadcast %cst_41 : f32 to vector<8x384xf32>
    %153 = arith.addf %152, %151 : vector<8x384xf32>
    %154 = arith.divf %152, %153 : vector<8x384xf32>
    %155 = vector.extract_strided_slice %154 {offsets = [0, 0], sizes = [8, 128], strides = [1, 1]} : vector<8x384xf32> to vector<8x128xf32>
    %156 = vector.extract_strided_slice %154 {offsets = [0, 128], sizes = [8, 128], strides = [1, 1]} : vector<8x384xf32> to vector<8x128xf32>
    %157 = vector.extract_strided_slice %154 {offsets = [0, 256], sizes = [8, 128], strides = [1, 1]} : vector<8x384xf32> to vector<8x128xf32>
    %158 = vector.extract_strided_slice %148 {offsets = [0, 384], sizes = [8, 128], strides = [1, 1]} : vector<8x512xf32> to vector<8x128xf32>
    %159 = math.tanh %158 : vector<8x128xf32>
    %160 = arith.mulf %156, %135 : vector<8x128xf32>
    %161 = arith.mulf %155, %159 : vector<8x128xf32>
    %162 = arith.addf %160, %161 : vector<8x128xf32>
    %163 = math.tanh %162 : vector<8x128xf32>
    %164 = arith.mulf %157, %163 : vector<8x128xf32>
    %165 = arith.index_cast %c5_i32 : i32 to index
    %c0_42 = arith.constant 0 : index
    %c0_43 = arith.constant 0 : index
    %166 = vector.load %arg7[%165, %c0_42, %c0_43] : memref<8x8x128xf32, #tpu.memory_space<vmem>>, vector<1x8x128xf32>
    %167 = vector.shape_cast %166 : vector<1x8x128xf32> to vector<8x128xf32>
    %168 = vector.shape_cast %164 : vector<8x128xf32> to vector<1x8x128xf32>
    tpu.vector_store %arg7[%165, %c0_42, %c0_43], %168 {strides = array<i32>} : memref<8x8x128xf32, #tpu.memory_space<vmem>>, vector<1x8x128xf32>,
    %c6_i32 = arith.constant 6 : i32
    %169 = arith.index_cast %c6_i32 : i32 to index
    %c0_44 = arith.constant 0 : index
    %c0_45 = arith.constant 0 : index
    %170 = vector.load %arg2[%169, %c0_44, %c0_45] : memref<8x8x512xf32, #tpu.memory_space<vmem>>, vector<1x8x512xf32>
    %171 = vector.shape_cast %170 : vector<1x8x512xf32> to vector<8x512xf32>
    %172 = vector.broadcast %4 : vector<1x512xf32> to vector<8x512xf32>
    %173 = arith.addf %171, %172 : vector<8x512xf32>
    %cst_46 = arith.constant dense<0.000000e+00> : vector<8x512xf32>
    %174 = tpu.matmul %164, %3, %cst_46 {dimension_numbers = #tpu.dot_dimension_numbers<[1], [0], [0], [1], [0, 0, 1, 1], [], []>} : vector<8x128xf32>, vector<128x512xf32>, vector<8x512xf32> -> vector<8x512xf32>
    %175 = arith.addf %173, %174 : vector<8x512xf32>
    %176 = vector.extract_strided_slice %175 {offsets = [0, 0], sizes = [8, 384], strides = [1, 1]} : vector<8x512xf32> to vector<8x384xf32>
    %177 = arith.negf %176 : vector<8x384xf32>
    %178 = math.exp %177 : vector<8x384xf32>
    %cst_47 = arith.constant 1.000000e+00 : f32
    %179 = vector.broadcast %cst_47 : f32 to vector<8x384xf32>
    %180 = arith.addf %179, %178 : vector<8x384xf32>
    %181 = arith.divf %179, %180 : vector<8x384xf32>
    %182 = vector.extract_strided_slice %181 {offsets = [0, 0], sizes = [8, 128], strides = [1, 1]} : vector<8x384xf32> to vector<8x128xf32>
    %183 = vector.extract_strided_slice %181 {offsets = [0, 128], sizes = [8, 128], strides = [1, 1]} : vector<8x384xf32> to vector<8x128xf32>
    %184 = vector.extract_strided_slice %181 {offsets = [0, 256], sizes = [8, 128], strides = [1, 1]} : vector<8x384xf32> to vector<8x128xf32>
    %185 = vector.extract_strided_slice %175 {offsets = [0, 384], sizes = [8, 128], strides = [1, 1]} : vector<8x512xf32> to vector<8x128xf32>
    %186 = math.tanh %185 : vector<8x128xf32>
    %187 = arith.mulf %183, %162 : vector<8x128xf32>
    %188 = arith.mulf %182, %186 : vector<8x128xf32>
    %189 = arith.addf %187, %188 : vector<8x128xf32>
    %190 = math.tanh %189 : vector<8x128xf32>
    %191 = arith.mulf %184, %190 : vector<8x128xf32>
    %192 = arith.index_cast %c6_i32 : i32 to index
    %c0_48 = arith.constant 0 : index
    %c0_49 = arith.constant 0 : index
    %193 = vector.load %arg7[%192, %c0_48, %c0_49] : memref<8x8x128xf32, #tpu.memory_space<vmem>>, vector<1x8x128xf32>
    %194 = vector.shape_cast %193 : vector<1x8x128xf32> to vector<8x128xf32>
    %195 = vector.shape_cast %191 : vector<8x128xf32> to vector<1x8x128xf32>
    tpu.vector_store %arg7[%192, %c0_48, %c0_49], %195 {strides = array<i32>} : memref<8x8x128xf32, #tpu.memory_space<vmem>>, vector<1x8x128xf32>,
    %c7_i32 = arith.constant 7 : i32
    %196 = arith.index_cast %c7_i32 : i32 to index
    %c0_50 = arith.constant 0 : index
    %c0_51 = arith.constant 0 : index
    %197 = vector.load %arg2[%196, %c0_50, %c0_51] : memref<8x8x512xf32, #tpu.memory_space<vmem>>, vector<1x8x512xf32>
    %198 = vector.shape_cast %197 : vector<1x8x512xf32> to vector<8x512xf32>
    %199 = vector.broadcast %4 : vector<1x512xf32> to vector<8x512xf32>
    %200 = arith.addf %198, %199 : vector<8x512xf32>
    %cst_52 = arith.constant dense<0.000000e+00> : vector<8x512xf32>
    %201 = tpu.matmul %191, %3, %cst_52 {dimension_numbers = #tpu.dot_dimension_numbers<[1], [0], [0], [1], [0, 0, 1, 1], [], []>} : vector<8x128xf32>, vector<128x512xf32>, vector<8x512xf32> -> vector<8x512xf32>
    %202 = arith.addf %200, %201 : vector<8x512xf32>
    %203 = vector.extract_strided_slice %202 {offsets = [0, 0], sizes = [8, 384], strides = [1, 1]} : vector<8x512xf32> to vector<8x384xf32>
    %204 = arith.negf %203 : vector<8x384xf32>
    %205 = math.exp %204 : vector<8x384xf32>
    %cst_53 = arith.constant 1.000000e+00 : f32
    %206 = vector.broadcast %cst_53 : f32 to vector<8x384xf32>
    %207 = arith.addf %206, %205 : vector<8x384xf32>
    %208 = arith.divf %206, %207 : vector<8x384xf32>
    %209 = vector.extract_strided_slice %208 {offsets = [0, 0], sizes = [8, 128], strides = [1, 1]} : vector<8x384xf32> to vector<8x128xf32>
    %210 = vector.extract_strided_slice %208 {offsets = [0, 128], sizes = [8, 128], strides = [1, 1]} : vector<8x384xf32> to vector<8x128xf32>
    %211 = vector.extract_strided_slice %208 {offsets = [0, 256], sizes = [8, 128], strides = [1, 1]} : vector<8x384xf32> to vector<8x128xf32>
    %212 = vector.extract_strided_slice %202 {offsets = [0, 384], sizes = [8, 128], strides = [1, 1]} : vector<8x512xf32> to vector<8x128xf32>
    %213 = math.tanh %212 : vector<8x128xf32>
    %214 = arith.mulf %210, %189 : vector<8x128xf32>
    %215 = arith.mulf %209, %213 : vector<8x128xf32>
    %216 = arith.addf %214, %215 : vector<8x128xf32>
    %217 = math.tanh %216 : vector<8x128xf32>
    %218 = arith.mulf %211, %217 : vector<8x128xf32>
    %219 = arith.index_cast %c7_i32 : i32 to index
    %c0_54 = arith.constant 0 : index
    %c0_55 = arith.constant 0 : index
    %220 = vector.load %arg7[%219, %c0_54, %c0_55] : memref<8x8x128xf32, #tpu.memory_space<vmem>>, vector<1x8x128xf32>
    %221 = vector.shape_cast %220 : vector<1x8x128xf32> to vector<8x128xf32>
    %222 = vector.shape_cast %218 : vector<8x128xf32> to vector<1x8x128xf32>
    tpu.vector_store %arg7[%219, %c0_54, %c0_55], %222 {strides = array<i32>} : memref<8x8x128xf32, #tpu.memory_space<vmem>>, vector<1x8x128xf32>,
    %c8_i32 = arith.constant 8 : i32
    %c0_56 = arith.constant 0 : index
    %c0_57 = arith.constant 0 : index
    %223 = vector.load %arg8[%c0_56, %c0_57] : memref<8x128xf32, #tpu.memory_space<vmem>>, vector<8x128xf32>
    tpu.vector_store %arg8[%c0_56, %c0_57], %218 {strides = array<i32>} : memref<8x128xf32, #tpu.memory_space<vmem>>, vector<8x128xf32>,
    %c0_58 = arith.constant 0 : index
    %c0_59 = arith.constant 0 : index
    %224 = vector.load %arg9[%c0_58, %c0_59] : memref<8x128xf32, #tpu.memory_space<vmem>>, vector<8x128xf32>
    tpu.vector_store %arg9[%c0_58, %c0_59], %216 {strides = array<i32>} : memref<8x128xf32, #tpu.memory_space<vmem>>, vector<8x128xf32>,
    return
  }
  func.func @transform_0(%arg0: i32, %arg1: i32) -> (i32, i32, i32) {
    %c0_i32 = arith.constant 0 : i32
    %c0_i32_0 = arith.constant 0 : i32
    return %arg1, %arg0, %c0_i32 : i32, i32, i32
  }
  func.func @transform_1(%arg0: i32, %arg1: i32) -> (i32, i32) {
    %c0_i32 = arith.constant 0 : i32
    %c0_i32_0 = arith.constant 0 : i32
    %c0_i32_1 = arith.constant 0 : i32
    return %c0_i32, %c0_i32_0 : i32, i32
  }
  func.func @transform_2(%arg0: i32, %arg1: i32) -> (i32, i32) {
    %c0_i32 = arith.constant 0 : i32
    %c0_i32_0 = arith.constant 0 : i32
    return %arg0, %c0_i32 : i32, i32
  }
  func.func @transform_3(%arg0: i32, %arg1: i32) -> (i32, i32) {
    %c0_i32 = arith.constant 0 : i32
    %c0_i32_0 = arith.constant 0 : i32
    return %arg0, %c0_i32 : i32, i32
  }
  func.func @transform_4(%arg0: i32, %arg1: i32) -> (i32, i32) {
    %c0_i32 = arith.constant 0 : i32
    %c0_i32_0 = arith.constant 0 : i32
    %c0_i32_1 = arith.constant 0 : i32
    return %c0_i32, %c0_i32_0 : i32, i32
  }
  func.func @transform_5(%arg0: i32, %arg1: i32) -> (i32, i32, i32) {
    %c0_i32 = arith.constant 0 : i32
    %c0_i32_0 = arith.constant 0 : i32
    return %arg1, %arg0, %c0_i32 : i32, i32, i32
  }
  func.func @transform_6(%arg0: i32, %arg1: i32) -> (i32, i32) {
    %c0_i32 = arith.constant 0 : i32
    %c0_i32_0 = arith.constant 0 : i32
    return %arg0, %c0_i32 : i32, i32
  }
  func.func @transform_7(%arg0: i32, %arg1: i32) -> (i32, i32) {
    %c0_i32 = arith.constant 0 : i32
    %c0_i32_0 = arith.constant 0 : i32
    return %arg0, %c0_i32 : i32, i32
  }
}

</mosaic_0001>

<bundles_post_ra>
// kernel: lstm_forward.1
= control target key start
LH: loop header
LB: loop body
LE: loop exit
PB: predicated region body
PF: predicated region fallthrough
CT: control target
= control target key end

     0   :  { %13 = vsyncpa [#allocation3], 0  ;;  %s1680_s27 = smov [#allocation2]   ;;  %s1681_s29 = smov 512   ;;  %s2697_s0 = inlined_call_operand.vmem [shape: f32[8,8,512], index: 0, kind: input, shape index: {}]   ;;  %s2698_s1 = inlined_call_operand.vmem [shape: f32[1,512], index: 1, kind: input, shape index: {}]   ;;  %s2699_s2 = inlined_call_operand.vmem [shape: f32[8,128], index: 2, kind: input, shape index: {}]   ;;  %s2700_s3 = inlined_call_operand.vmem [shape: f32[8,128], index: 3, kind: input, shape index: {}]   ;;  %s2701_s4 = inlined_call_operand.hbm [shape: f32[128,512], index: 4, kind: input, shape index: {}]   ;;  %s2702_s5 = inlined_call_operand.vmem [shape: f32[8,8,128], index: 5, kind: output, shape index: {0}]   ;;  %s2703_s6 = inlined_call_operand.vmem [shape: f32[8,128], index: 6, kind: output, shape index: {1}]   ;;  %s2704_s7 = inlined_call_operand.vmem [shape: f32[8,128], index: 7, kind: output, shape index: {2}]  }
   0x1   :  { %s26_s26 = sshll.u32 %s2701_s4, 4  ;;  %s28_s28 = sshll.u32 %s1680_s27, 4  ;;  %s27_s26 = int_to_ptr.hbm [resolvable:$true] %s26_s26  ;;  %s29_s28 = int_to_ptr.vmem [resolvable:$true] %s28_s28 }
   0x2   :  { %s1682_s30 = smov 32  }
   0x3   :  { %34 = dma.hbm_to_vmem [thread:$0]  %s27_s26, 8192, %s29_s28, [#allocation3], %s1681_s29, %s1681_s29, %s1682_s30  }
   0x4   :  { %1678 = dma.done.wait [#allocation3], 8192  }
   0x5   :  { %1679 = vsyncadd [#allocation3], 4294959104  ;;  %v1726_v0 = vld [vmem:[#allocation2 + $0x1e0] sm:$0xff]  ;;  %v1728_v1 = vld [vmem:[#allocation2 + $0x1e8] sm:$0xff] }
   0x6   :  { %2822 = vst [vmem:[#allocation5_spill] sm:$0xff] %v1726_v0  ;;  %v1730_v2 = vld [vmem:[#allocation2 + $0x1f0] sm:$0xff]  ;;  %131 = vmatpush.msra.mxu0 %v1726_v0  ;;  %151 = vmatpush.msra.mxu1 %v1728_v1  ;;  %v1734_v3 = vld [vmem:[#allocation2 + $0x1c0] sm:$0xff]  ;;  %v1736_v4 = vld [vmem:[#allocation2 + $0x1c8] sm:$0xff] }
   0x7   :  { %v1738_v5 = vld [vmem:[#allocation2 + $0x1d0] sm:$0xff]  ;;  %171 = vmatpush.msra.mxu2 %v1730_v2  ;;  %v1741_v6 = vld [vmem:[#allocation2 + $0x1a0] sm:$0xff]  ;;  %v1743_v7 = vld [vmem:[#allocation2 + $0x1a8] sm:$0xff] }
   0x8   :  { %132 = vmatpush.msra.mxu0 %v1734_v3  ;;  %152 = vmatpush.msra.mxu1 %v1736_v4  ;;  %v1747_v8 = vld [vmem:[#allocation2 + $0x1b0] sm:$0xff]  ;;  %v1750_v9 = vld [vmem:[#allocation2 + $0x180] sm:$0xff]  ;;  %v1752_v10 = vld [vmem:[#allocation2 + $0x188] sm:$0xff] }
   0x9   :  { %172 = vmatpush.msra.mxu2 %v1738_v5  ;;  %v1756_v11 = vld [vmem:[#allocation2 + $0x190] sm:$0xff]  ;;  %v1759_v12 = vld [vmem:[#allocation2 + $0x160] sm:$0xff]  ;;  %v1761_v13 = vld [vmem:[#allocation2 + $0x168] sm:$0xff] }
   0xa   :  { %133 = vmatpush.msra.mxu0 %v1741_v6  ;;  %153 = vmatpush.msra.mxu1 %v1743_v7  ;;  %v1765_v14 = vld [vmem:[#allocation2 + $0x170] sm:$0xff]  ;;  %v1768_v15 = vld [vmem:[#allocation2 + $0x140] sm:$0xff]  ;;  %v1770_v16 = vld [vmem:[#allocation2 + $0x148] sm:$0xff] }
   0xb   :  { %173 = vmatpush.msra.mxu2 %v1747_v8  ;;  %v1772_v17 = vld [vmem:[#allocation2 + $0x1f8] sm:$0xff]  ;;  %v1776_v18 = vld [vmem:[#allocation2 + $0x150] sm:$0xff]  ;;  %v1781_v20 = vld [vmem:[#allocation2 + $0x120] sm:$0xff] }
   0xc   :  { %134 = vmatpush.msra.mxu0 %v1750_v9  ;;  %154 = vmatpush.msra.mxu1 %v1752_v10  ;;  %v1778_v19 = vld [vmem:[#allocation2 + $0x1d8] sm:$0xff]  ;;  %v1783_v21 = vld [vmem:[#allocation2 + $0x128] sm:$0xff]  ;;  %v1788_v22 = vld [vmem:[#allocation2 + $0x130] sm:$0xff] }
   0xd   :  { %174 = vmatpush.msra.mxu2 %v1756_v11  ;;  %191 = vmatpush.msra.mxu3 %v1772_v17  ;;  %v1790_v23 = vld [vmem:[#allocation2 + $0x1b8] sm:$0xff]  ;;  %v1793_v24 = vld [vmem:[#allocation2 + $0x100] sm:$0xff]  ;;  %v1795_v25 = vld [vmem:[#allocation2 + $0x108] sm:$0xff] }
   0xe   :  { %135 = vmatpush.msra.mxu0 %v1759_v12  ;;  %155 = vmatpush.msra.mxu1 %v1761_v13  ;;  %v1800_v26 = vld [vmem:[#allocation2 + $0x110] sm:$0xff]  ;;  %v1802_v27 = vld [vmem:[#allocation2 + $0x198] sm:$0xff]  ;;  %v1805_v28 = vld [vmem:[#allocation2 + $0xe0] sm:$0xff] }
   0xf   :  { %175 = vmatpush.msra.mxu2 %v1765_v14  ;;  %192 = vmatpush.msra.mxu3 %v1778_v19  ;;  %v1807_v29 = vld [vmem:[#allocation2 + $0xe8] sm:$0xff]  ;;  %v1812_v30 = vld [vmem:[#allocation2 + $0xf0] sm:$0xff]  ;;  %v1814_v31 = vld [vmem:[#allocation2 + $0x178] sm:$0xff] }
  0x10   :  { %136 = vmatpush.msra.mxu0 %v1768_v15  ;;  %156 = vmatpush.msra.mxu1 %v1770_v16  ;;  %v1817_v32 = vld [vmem:[#allocation2 + $0xc0] sm:$0xff]  ;;  %v1819_v33 = vld [vmem:[#allocation2 + $0xc8] sm:$0xff]  ;;  %v1824_v34 = vld [vmem:[#allocation2 + $0xd0] sm:$0xff] }
  0x11   :  { %176 = vmatpush.msra.mxu2 %v1776_v18  ;;  %193 = vmatpush.msra.mxu3 %v1790_v23  ;;  %2823 = vst [vmem:[#allocation6_spill] sm:$0xff] %v1824_v34  ;;  %v1826_v35 = vld [vmem:[#allocation2 + $0x158] sm:$0xff]  ;;  %v1829_v36 = vld [vmem:[#allocation2 + $0xa0] sm:$0xff]  ;;  %v1831_v37 = vld [vmem:[#allocation2 + $0xa8] sm:$0xff] }
  0x12   :  { %137 = vmatpush.msra.mxu0 %v1781_v20  ;;  %157 = vmatpush.msra.mxu1 %v1783_v21  ;;  %2824 = vst [vmem:[#allocation7_spill] sm:$0xff] %v1829_v36  ;;  %v1836_v38 = vld [vmem:[#allocation2 + $0xb0] sm:$0xff]  ;;  %v1838_v39 = vld [vmem:[#allocation2 + $0x138] sm:$0xff]  ;;  %v1841_v40 = vld [vmem:[#allocation2 + $0x80] sm:$0xff] }
  0x13   :  { %177 = vmatpush.msra.mxu2 %v1788_v22  ;;  %194 = vmatpush.msra.mxu3 %v1802_v27  ;;  %2825 = vst [vmem:[#allocation8_spill] sm:$0xff] %v1831_v37  ;;  %v1843_v41 = vld [vmem:[#allocation2 + $0x88] sm:$0xff]  ;;  %v1848_v42 = vld [vmem:[#allocation2 + $0x90] sm:$0xff]  ;;  %v1850_v43 = vld [vmem:[#allocation2 + $0x118] sm:$0xff] }
  0x14   :  { %138 = vmatpush.msra.mxu0 %v1793_v24  ;;  %158 = vmatpush.msra.mxu1 %v1795_v25  ;;  %2826 = vst [vmem:[#allocation9_spill] sm:$0xff] %v1836_v38  ;;  %v1853_v44 = vld [vmem:[#allocation2 + $0x60] sm:$0xff]  ;;  %v1855_v45 = vld [vmem:[#allocation2 + $0x68] sm:$0xff]  ;;  %v1860_v46 = vld [vmem:[#allocation2 + $0x70] sm:$0xff] }
  0x15   :  { %178 = vmatpush.msra.mxu2 %v1800_v26  ;;  %195 = vmatpush.msra.mxu3 %v1814_v31  ;;  %2827 = vst [vmem:[#allocation10_spill] sm:$0xff] %v1841_v40  ;;  %v1862_v47 = vld [vmem:[#allocation2 + $0xf8] sm:$0xff]  ;;  %v1865_v48 = vld [vmem:[#allocation2 + $0x40] sm:$0xff]  ;;  %v1867_v49 = vld [vmem:[#allocation2 + $0x48] sm:$0xff] }
  0x16   :  { %139 = vmatpush.msra.mxu0 %v1805_v28  ;;  %159 = vmatpush.msra.mxu1 %v1807_v29  ;;  %2828 = vst [vmem:[#allocation11_spill] sm:$0xff] %v1843_v41  ;;  %v1872_v50 = vld [vmem:[#allocation2 + $0x50] sm:$0xff]  ;;  %v1874_v51 = vld [vmem:[#allocation2 + $0xd8] sm:$0xff]  ;;  %v1877_v52 = vld [vmem:[#allocation2 + $0x20] sm:$0xff] }
  0x17   :  { %179 = vmatpush.msra.mxu2 %v1812_v30  ;;  %196 = vmatpush.msra.mxu3 %v1826_v35  ;;  %2829 = vst [vmem:[#allocation12_spill] sm:$0xff] %v1848_v42  ;;  %v1879_v53 = vld [vmem:[#allocation2 + $0x28] sm:$0xff]  ;;  %v1884_v54 = vld [vmem:[#allocation2 + $0x30] sm:$0xff]  ;;  %v1886_v55 = vld [vmem:[#allocation2 + $0xb8] sm:$0xff] }
  0x18   :  { %140 = vmatpush.msra.mxu0 %v1817_v32  ;;  %160 = vmatpush.msra.mxu1 %v1819_v33  ;;  %2830 = vst [vmem:[#allocation13_spill] sm:$0xff] %v1853_v44  ;;  %v1889_v56 = vld [vmem:[#allocation2] sm:$0xff]  ;;  %v1891_v57 = vld [vmem:[#allocation2 + $0x8] sm:$0xff]  ;;  %v1896_v58 = vld [vmem:[#allocation2 + $0x10] sm:$0xff] }
  0x19   :  { %180 = vmatpush.msra.mxu2 %v1824_v34  ;;  %2831 = vst [vmem:[#allocation14_spill] sm:$0xff] %v1855_v45  ;;  %197 = vmatpush.msra.mxu3 %v1838_v39  ;;  %v43_v59 = vld [vmem:[%s2699_s2] sm:$0xff]  ;;  %v1905_v60 = vld [vmem:[#allocation2 + $0x98] sm:$0xff] }
  0x1a   :  { %141 = vmatpush.msra.mxu0 %v1829_v36  ;;  %161 = vmatpush.msra.mxu1 %v1831_v37  ;;  %2832 = vst [vmem:[#allocation15_spill] sm:$0xff] %v1860_v46  ;;  %v1908_v61 = vld [vmem:[#allocation2 + $0x78] sm:$0xff] }
  0x1b   :  { %181 = vmatpush.msra.mxu2 %v1836_v38  ;;  %2833 = vst [vmem:[#allocation16_spill] sm:$0xff] %v1865_v48  ;;  %198 = vmatpush.msra.mxu3 %v1850_v43  ;;  %v1912_v62 = vld [vmem:[#allocation2 + $0x58] sm:$0xff] }
  0x1c   :  { %142 = vmatpush.msra.mxu0 %v1841_v40  ;;  %162 = vmatpush.msra.mxu1 %v1843_v41  ;;  %2834 = vst [vmem:[#allocation17_spill] sm:$0xff] %v1867_v49  ;;  %v1918_v63 = vld [vmem:[#allocation2 + $0x38] sm:$0xff] }
  0x1d   :  { %182 = vmatpush.msra.mxu2 %v1848_v42  ;;  %2835 = vst [vmem:[#allocation18_spill] sm:$0xff] %v1872_v50  ;;  %199 = vmatpush.msra.mxu3 %v1862_v47 }
  0x1e   :  { %143 = vmatpush.msra.mxu0 %v1853_v44  ;;  %163 = vmatpush.msra.mxu1 %v1855_v45  ;;  %2836 = vst [vmem:[#allocation19_spill] sm:$0xff] %v1874_v51 }
  0x1f   :  { %183 = vmatpush.msra.mxu2 %v1860_v46  ;;  %2837 = vst [vmem:[#allocation20_spill] sm:$0xff] %v1877_v52  ;;  %200 = vmatpush.msra.mxu3 %v1874_v51 }
  0x20   :  { %2838 = vst [vmem:[#allocation21_spill] sm:$0xff] %v1879_v53  ;;  %144 = vmatpush.msra.mxu0 %v1865_v48  ;;  %164 = vmatpush.msra.mxu1 %v1867_v49 }
  0x21   :  { %2839 = vst [vmem:[#allocation22_spill] sm:$0xff] %v1884_v54  ;;  %184 = vmatpush.msra.mxu2 %v1872_v50  ;;  %201 = vmatpush.msra.mxu3 %v1886_v55 }
  0x22   :  { %2840 = vst [vmem:[#allocation23_spill] sm:$0xff] %v1886_v55  ;;  %145 = vmatpush.msra.mxu0 %v1877_v52  ;;  %165 = vmatpush.msra.mxu1 %v1879_v53 }
  0x23   :  { %2841 = vst [vmem:[#allocation24_spill] sm:$0xff] %v1889_v56  ;;  %185 = vmatpush.msra.mxu2 %v1884_v54  ;;  %202 = vmatpush.msra.mxu3 %v1905_v60 }
  0x24   :  { %2842 = vst [vmem:[#allocation25_spill] sm:$0xff] %v1891_v57  ;;  %146 = vmatpush.msra.mxu0 %v1889_v56  ;;  %166 = vmatpush.msra.mxu1 %v1891_v57 }
  0x25   :  { %2843 = vst [vmem:[#allocation26_spill] sm:$0xff] %v1896_v58  ;;  %186 = vmatpush.msra.mxu2 %v1896_v58  ;;  %147 = vmatmul.f32.vlgmr.msra.gmra.mxu0 %v43_v59 }
  0x26   :  { %2844 = vst [vmem:[#allocation27_spill] sm:$0xff] %v1905_v60  ;;  %167 = vmatmul.f32.vlgmr.msra.gmra.mxu1 %v43_v59  ;;  %187 = vmatmul.f32.vlgmr.msra.gmra.mxu2 %v43_v59 }
  0x27   :  { %2845 = vst [vmem:[#allocation28_spill] sm:$0xff] %v1908_v61  ;;  %288 = vmatpush.msrb.mxu0 %v1726_v0  ;;  %308 = vmatpush.msrb.mxu1 %v1728_v1  ;;  %v1924_v0 = vld [vmem:[#allocation2 + $0x18] sm:$0xff] }
  0x28   :  { %2846 = vst [vmem:[#allocation29_spill] sm:$0xff] %v1912_v62  ;;  %328 = vmatpush.msrb.mxu2 %v1730_v2  ;;  %203 = vmatpush.msra.mxu3 %v1908_v61 }
  0x29   :  { %289 = vmatpush.msrb.mxu0 %v1734_v3  ;;  %2847 = vst [vmem:[#allocation30_spill] sm:$0xff] %v1918_v63  ;;  %309 = vmatpush.msrb.mxu1 %v1736_v4 }
  0x2a   :  { %329 = vmatpush.msrb.mxu2 %v1738_v5  ;;  %204 = vmatpush.msra.mxu3 %v1912_v62  ;;  %2848 = vst [vmem:[#allocation31_spill] sm:$0xff] %v1924_v0 }
  0x2b   :  { %290 = vmatpush.msrb.mxu0 %v1741_v6  ;;  %310 = vmatpush.msrb.mxu1 %v1743_v7 }
  0x2c   :  { %330 = vmatpush.msrb.mxu2 %v1747_v8  ;;  %205 = vmatpush.msra.mxu3 %v1918_v63 }
  0x2d   :  { %291 = vmatpush.msrb.mxu0 %v1750_v9  ;;  %311 = vmatpush.msrb.mxu1 %v1752_v10 }
  0x2e   :  { %331 = vmatpush.msrb.mxu2 %v1756_v11  ;;  %206 = vmatpush.msra.mxu3 %v1924_v0 }
  0x2f   :  { %292 = vmatpush.msrb.mxu0 %v1759_v12  ;;  %207 = vmatmul.f32.vlgmr.msra.gmra.mxu3 %v43_v59  ;;  %v2849_v59 = vld [vmem:[#allocation5_spill] sm:$0xff] }
  0x30   :  { %312 = vmatpush.msrb.mxu1 %v1761_v13  ;;  %348 = vmatpush.msrb.mxu3 %v1772_v17 }
  0x31   :  { %332 = vmatpush.msrb.mxu2 %v1765_v14  ;;  %293 = vmatpush.msrb.mxu0 %v1768_v15 }
  0x32   :  { %313 = vmatpush.msrb.mxu1 %v1770_v16  ;;  %349 = vmatpush.msrb.mxu3 %v1778_v19 }
  0x33   :  { %333 = vmatpush.msrb.mxu2 %v1776_v18  ;;  %294 = vmatpush.msrb.mxu0 %v1781_v20 }
  0x34   :  { %314 = vmatpush.msrb.mxu1 %v1783_v21  ;;  %350 = vmatpush.msrb.mxu3 %v1790_v23 }
  0x35   :  { %334 = vmatpush.msrb.mxu2 %v1788_v22  ;;  %295 = vmatpush.msrb.mxu0 %v1793_v24 }
  0x36   :  { %315 = vmatpush.msrb.mxu1 %v1795_v25  ;;  %351 = vmatpush.msrb.mxu3 %v1802_v27 }
  0x37   :  { %335 = vmatpush.msrb.mxu2 %v1800_v26  ;;  %296 = vmatpush.msrb.mxu0 %v1805_v28 }
  0x38   :  { %316 = vmatpush.msrb.mxu1 %v1807_v29  ;;  %352 = vmatpush.msrb.mxu3 %v1814_v31 }
  0x39   :  { %336 = vmatpush.msrb.mxu2 %v1812_v30  ;;  %297 = vmatpush.msrb.mxu0 %v1817_v32 }
  0x3a   :  { %317 = vmatpush.msrb.mxu1 %v1819_v33  ;;  %353 = vmatpush.msrb.mxu3 %v1826_v35 }
  0x3b   :  { %337 = vmatpush.msrb.mxu2 %v1824_v34  ;;  %298 = vmatpush.msrb.mxu0 %v1829_v36 }
  0x3c   :  { %318 = vmatpush.msrb.mxu1 %v1831_v37  ;;  %354 = vmatpush.msrb.mxu3 %v1838_v39 }
  0x3d   :  { %338 = vmatpush.msrb.mxu2 %v1836_v38  ;;  %299 = vmatpush.msrb.mxu0 %v1841_v40 }
  0x3e   :  { %319 = vmatpush.msrb.mxu1 %v1843_v41  ;;  %355 = vmatpush.msrb.mxu3 %v1850_v43 }
  0x3f   :  { %339 = vmatpush.msrb.mxu2 %v1848_v42  ;;  %300 = vmatpush.msrb.mxu0 %v1853_v44 }
  0x40   :  { %320 = vmatpush.msrb.mxu1 %v1855_v45  ;;  %356 = vmatpush.msrb.mxu3 %v1862_v47 }
  0x41   :  { %340 = vmatpush.msrb.mxu2 %v1860_v46  ;;  %301 = vmatpush.msrb.mxu0 %v1865_v48 }
  0x42   :  { %321 = vmatpush.msrb.mxu1 %v1867_v49  ;;  %357 = vmatpush.msrb.mxu3 %v1874_v51 }
  0x43   :  { %341 = vmatpush.msrb.mxu2 %v1872_v50  ;;  %302 = vmatpush.msrb.mxu0 %v1877_v52 }
  0x44   :  { %322 = vmatpush.msrb.mxu1 %v1879_v53  ;;  %358 = vmatpush.msrb.mxu3 %v1886_v55 }
  0x45   :  { %342 = vmatpush.msrb.mxu2 %v1884_v54  ;;  %303 = vmatpush.msrb.mxu0 %v1889_v56 }
  0x46   :  { %323 = vmatpush.msrb.mxu1 %v1891_v57  ;;  %359 = vmatpush.msrb.mxu3 %v1905_v60 }
  0x47   :  { %343 = vmatpush.msrb.mxu2 %v1896_v58  ;;  %446 = vmatpush.msra.mxu0 %v2849_v59 }
  0x48   :  { %466 = vmatpush.msra.mxu1 %v1728_v1  ;;  %360 = vmatpush.msrb.mxu3 %v1908_v61 }
  0x49   :  { %486 = vmatpush.msra.mxu2 %v1730_v2  ;;  %447 = vmatpush.msra.mxu0 %v1734_v3 }
  0x4a   :  { %467 = vmatpush.msra.mxu1 %v1736_v4  ;;  %361 = vmatpush.msrb.mxu3 %v1912_v62 }
  0x4b   :  { %487 = vmatpush.msra.mxu2 %v1738_v5  ;;  %448 = vmatpush.msra.mxu0 %v1741_v6 }
  0x4c   :  { %468 = vmatpush.msra.mxu1 %v1743_v7  ;;  %362 = vmatpush.msrb.mxu3 %v1918_v63 }
  0x4d   :  { %488 = vmatpush.msra.mxu2 %v1747_v8  ;;  %449 = vmatpush.msra.mxu0 %v1750_v9 }
  0x4e   :  { %469 = vmatpush.msra.mxu1 %v1752_v10  ;;  %363 = vmatpush.msrb.mxu3 %v1924_v0 }
  0x4f   :  { %489 = vmatpush.msra.mxu2 %v1756_v11  ;;  %450 = vmatpush.msra.mxu0 %v1759_v12 }
  0x50   :  { %506 = vmatpush.msra.mxu3 %v1772_v17  ;;  %470 = vmatpush.msra.mxu1 %v1761_v13 }
  0x51   :  { %490 = vmatpush.msra.mxu2 %v1765_v14  ;;  %451 = vmatpush.msra.mxu0 %v1768_v15 }
  0x52   :  { %507 = vmatpush.msra.mxu3 %v1778_v19  ;;  %471 = vmatpush.msra.mxu1 %v1770_v16 }
  0x53   :  { %491 = vmatpush.msra.mxu2 %v1776_v18  ;;  %452 = vmatpush.msra.mxu0 %v1781_v20 }
  0x54   :  { %508 = vmatpush.msra.mxu3 %v1790_v23  ;;  %472 = vmatpush.msra.mxu1 %v1783_v21 }
  0x55   :  { %492 = vmatpush.msra.mxu2 %v1788_v22  ;;  %453 = vmatpush.msra.mxu0 %v1793_v24 }
  0x56   :  { %509 = vmatpush.msra.mxu3 %v1802_v27  ;;  %473 = vmatpush.msra.mxu1 %v1795_v25 }
  0x57   :  { %493 = vmatpush.msra.mxu2 %v1800_v26  ;;  %454 = vmatpush.msra.mxu0 %v1805_v28 }
  0x58   :  { %510 = vmatpush.msra.mxu3 %v1814_v31  ;;  %474 = vmatpush.msra.mxu1 %v1807_v29 }
  0x59   :  { %494 = vmatpush.msra.mxu2 %v1812_v30  ;;  %455 = vmatpush.msra.mxu0 %v1817_v32 }
  0x5a   :  { %511 = vmatpush.msra.mxu3 %v1826_v35  ;;  %475 = vmatpush.msra.mxu1 %v1819_v33 }
  0x5b   :  { %495 = vmatpush.msra.mxu2 %v1824_v34  ;;  %456 = vmatpush.msra.mxu0 %v1829_v36 }
  0x5c   :  { %512 = vmatpush.msra.mxu3 %v1838_v39  ;;  %476 = vmatpush.msra.mxu1 %v1831_v37 }
  0x5d   :  { %496 = vmatpush.msra.mxu2 %v1836_v38  ;;  %457 = vmatpush.msra.mxu0 %v1841_v40 }
  0x5e   :  { %513 = vmatpush.msra.mxu3 %v1850_v43  ;;  %477 = vmatpush.msra.mxu1 %v1843_v41 }
  0x5f   :  { %497 = vmatpush.msra.mxu2 %v1848_v42  ;;  %458 = vmatpush.msra.mxu0 %v1853_v44 }
  0x60   :  { %514 = vmatpush.msra.mxu3 %v1862_v47  ;;  %478 = vmatpush.msra.mxu1 %v1855_v45 }
  0x61   :  { %498 = vmatpush.msra.mxu2 %v1860_v46  ;;  %459 = vmatpush.msra.mxu0 %v1865_v48  ;;  %v116_v48 = vld [vmem:[%s2697_s0 + $0x10] sm:$0xff] }
  0x62   :  { %515 = vmatpush.msra.mxu3 %v1874_v51  ;;  %479 = vmatpush.msra.mxu1 %v1867_v49 }
  0x63   :  { %499 = vmatpush.msra.mxu2 %v1872_v50  ;;  %460 = vmatpush.msra.mxu0 %v1877_v52 }
  0x64   :  { %516 = vmatpush.msra.mxu3 %v1886_v55  ;;  %480 = vmatpush.msra.mxu1 %v1879_v53 }
  0x65   :  { %500 = vmatpush.msra.mxu2 %v1884_v54  ;;  %461 = vmatpush.msra.mxu0 %v1889_v56  ;;  %v111_v54 = vld [vmem:[%s2698_s1] sm:$0xf] }
  0x66   :  { %517 = vmatpush.msra.mxu3 %v1905_v60  ;;  %481 = vmatpush.msra.mxu1 %v1891_v57  ;;  %v2052_v53 = vperm.slane %v111_v54, 0  ;;  %v114_v57 = vld [vmem:[%s2697_s0] sm:$0xff]  ;;  %v2057_v56 = vperm.slane %v111_v54, 1 }
  0x67   :  { %501 = vmatpush.msra.mxu2 %v1896_v58  ;;  %v115_v58 = vld [vmem:[%s2697_s0 + $0x8] sm:$0xff] }
  0x68   :  { %518 = vmatpush.msra.mxu3 %v1908_v61  ;;  %2850 = vst [vmem:[#allocation5_spill] sm:$0xff] %v2052_v53 }
  0x69   :  { %2851 = vst [vmem:[#allocation32_spill] sm:$0xff] %v2057_v56 }
  0x6a   :  { %519 = vmatpush.msra.mxu3 %v1912_v62  ;;  %v2064_v62 = vperm.slane %v111_v54, 2 }
  0x6c   :  { %520 = vmatpush.msra.mxu3 %v1918_v63  ;;  %v127_v63 = vadd.f32 %v2052_v53, %v114_v57  ;;  %2852 = vst [vmem:[#allocation33_spill] sm:$0xff] %v2064_v62  ;;  %v129_v44 = vadd.f32 %v2064_v62, %v116_v48 }
  0x6e   :  { %521 = vmatpush.msra.mxu3 %v1924_v0  ;;  %v128_v0 = vadd.f32 %v2057_v56, %v115_v58  ;;  %v2070_v58 = vperm.slane %v111_v54, 3 }
  0x70   :  { %2853 = vst [vmem:[#allocation34_spill] sm:$0xff] %v2070_v58 }
  0xa2   :  { %v148_v52 = vpop.f32.mrf.mxu0 }
  0xa3   :  { %v211_v50 = vadd.f32 %v148_v52, %v127_v63  ;;  %v168_v49 = vpop.f32.mrf.mxu1  ;;  %v117_v52 = vld [vmem:[%s2697_s0 + $0x18] sm:$0xff] }
  0xa4   :  { %v212_v61 = vadd.f32 %v168_v49, %v128_v0  ;;  %v130_v49 = vadd.f32 %v2070_v58, %v117_v52 }
  0xa5   :  { %v1400_v46 = vmul.f32 -1.442695, %v211_v50 }
  0xa6   :  { %v1401_v45 = vmul.f32 -1.442695, %v212_v61 }
  0xa7   :  { %1462 = vpow2.f32 %v1400_v46 }
  0xa8   :  { %1464 = vpow2.f32 %v1401_v45 }
  0xa9   :  { %v188_v60 = vpop.f32.mrf.mxu2 }
  0xaa   :  { %v213_v57 = vadd.f32 %v188_v60, %v129_v44 }
  0xac   :  { %v1402_v53 = vmul.f32 -1.442695, %v213_v57 }
  0xad   :  { %v1463_v56 = vpop.eup %1462 }
  0xae   :  { %v1465_v63 = vpop.eup %1464  ;;  %v224_v42 = vadd.f32 1.0, %v1463_v56  ;;  %1466 = vpow2.f32 %v1402_v53 }
  0xaf   :  { %v225_v0 = vadd.f32 1.0, %v1465_v63 }
  0xb0   :  { %1468 = vrcp.f32 %v224_v42  ;;  %v238_v41 = vand.u32 2147483648, %v224_v42  ;;  %v236_v63 = vand.u32 2147483647, %v224_v42  ;;  %vm232_vm2 = vweird.f32 %v224_v42 }
  0xb1   :  { %1470 = vrcp.f32 %v225_v0  ;;  %v253_v56 = vand.u32 2147483648, %v225_v0  ;;  %v251_v52 = vand.u32 2147483647, %v225_v0  ;;  %vm247_vm3 = vweird.f32 %v225_v0 }
  0xb2   :  { %v208_v46 = vpop.f32.mrf.mxu3  ;;  %vm237_vm6 = vcmp.eq.f32.partialorder %v236_v63, 8.507059e+37 }
  0xb3   :  { %v214_v48 = vadd.f32 %v208_v46, %v130_v49  ;;  %vm252_vm7 = vcmp.eq.f32.partialorder %v251_v52, 8.507059e+37  ;;  %v2858_v52 = vld [vmem:[#allocation23_spill] sm:$0xff] }
  0xb4   :  { %v1467_v45 = vpop.eup %1466 }
  0xb5   :  { %v226_v44 = vadd.f32 1.0, %v1467_v45  ;;  %v239_v45 = vor.u32 1.1754944e-38, %v238_v41 }
  0xb6   :  { %v1469_v50 = vpop.eup %1468 }
  0xb7   :  { %v1471_v54 = vpop.eup %1470  ;;  %v228_v60 = vmul.f32 %v1469_v50, %v224_v42  ;;  %1472 = vrcp.f32 %v226_v44  ;;  %vm233_vm0 = vweird.f32 %v1469_v50  ;;  %v268_v41 = vand.u32 2147483648, %v226_v44 }
  0xb8   :  { %v243_v61 = vmul.f32 %v1471_v54, %v225_v0  ;;  %1474 = vtanh.f32 %v214_v48  ;;  %vm248_vm1 = vweird.f32 %v1471_v54  ;;  %vm234_vm4 = vmor %vm232_vm2, %vm233_vm0  ;;  %v254_v48 = vor.u32 1.1754944e-38, %v253_v56 }
  0xb9   :  { %v229_v57 = vsub.f32 1.0, %v228_v60  ;;  %vm249_vm5 = vmor %vm247_vm3, %vm248_vm1  ;;  %v45_v60 = vld [vmem:[%s2700_s3] sm:$0xff]  ;;  %vm262_vm9 = vweird.f32 %v226_v44  ;;  %v266_v56 = vand.u32 2147483647, %v226_v44 }
  0xba   :  { %v244_v62 = vsub.f32 1.0, %v243_v61 }
  0xbb   :  { %v230_v53 = vmul.f32 %v1469_v50, %v229_v57  ;;  %vm267_vm11 = vcmp.eq.f32.partialorder %v266_v56, 8.507059e+37  ;;  %v2872_v56 = vld [vmem:[#allocation21_spill] sm:$0xff] }
  0xbc   :  { %v245_v40 = vmul.f32 %v1471_v54, %v244_v62 }
  0xbd   :  { %v1473_v58 = vpop.eup %1472  ;;  %v231_v55 = vadd.f32 %v1469_v50, %v230_v53 }
  0xbe   :  { %v1475_v49 = vpop.eup %1474  ;;  %v258_v46 = vmul.f32 %v1473_v58, %v226_v44  ;;  %v246_v38 = vadd.f32 %v1471_v54, %v245_v40  ;;  %vm263_vm8 = vweird.f32 %v1473_v58  ;;  %v2857_v44 = vld [vmem:[#allocation9_spill] sm:$0xff] }
  0xbf   :  { %v235_v61 = vsel %vm234_vm4, %v1469_v50, %v231_v55  ;;  %vm264_vm10 = vmor %vm262_vm9, %vm263_vm8  ;;  %v269_v50 = vor.u32 1.1754944e-38, %v268_v41  ;;  %v2871_v41 = vld [vmem:[#allocation20_spill] sm:$0xff] }
  0xc0   :  { %v259_v62 = vsub.f32 1.0, %v258_v46  ;;  %v240_v57 = vsel %vm237_vm6, %v239_v45, %v235_v61  ;;  %v250_v37 = vsel %vm249_vm5, %v1471_v54, %v246_v38  ;;  %v2860_v46 = vld [vmem:[#allocation11_spill] sm:$0xff]  ;;  %v2861_v45 = vld [vmem:[#allocation12_spill] sm:$0xff]  ;;  %v2864_v61 = vld [vmem:[#allocation14_spill] sm:$0xff] }
  0xc1   :  { %v255_v53 = vsel %vm252_vm7, %v254_v48, %v250_v37  ;;  %v274_v42 = vmul.f32 %v1475_v49, %v240_v57  ;;  %v2855_v37 = vld [vmem:[#allocation7_spill] sm:$0xff]  ;;  %v2859_v49 = vld [vmem:[#allocation10_spill] sm:$0xff]  ;;  %v2866_v57 = vld [vmem:[#allocation28_spill] sm:$0xff] }
  0xc2   :  { %v260_v36 = vmul.f32 %v1473_v58, %v259_v62  ;;  %v273_v0 = vmul.f32 %v255_v53, %v45_v60  ;;  %v2862_v48 = vld [vmem:[#allocation27_spill] sm:$0xff]  ;;  %v2863_v60 = vld [vmem:[#allocation13_spill] sm:$0xff]  ;;  %v2867_v53 = vld [vmem:[#allocation16_spill] sm:$0xff] }
  0xc3   :  { %v2865_v62 = vld [vmem:[#allocation15_spill] sm:$0xff] }
  0xc4   :  { %v2079_v51 = vadd.f32 %v274_v42, %v273_v0  ;;  %v261_v40 = vadd.f32 %v1473_v58, %v260_v36  ;;  %v2854_v36 = vld [vmem:[#allocation19_spill] sm:$0xff]  ;;  %v2868_v42 = vld [vmem:[#allocation17_spill] sm:$0xff]  ;;  %v2869_v0 = vld [vmem:[#allocation18_spill] sm:$0xff] }
  0xc6   :  { %1476 = vtanh.f32 %v2079_v51  ;;  %v265_v55 = vsel %vm264_vm10, %v1473_v58, %v261_v40  ;;  %v2856_v58 = vld [vmem:[#allocation8_spill] sm:$0xff]  ;;  %v2870_v40 = vld [vmem:[#allocation29_spill] sm:$0xff] }
  0xc7   :  { %v270_v38 = vsel %vm267_vm11, %v269_v50, %v265_v55  ;;  %v2873_v55 = vld [vmem:[#allocation22_spill] sm:$0xff] }
  0xc8   :  { %v2874_v50 = vld [vmem:[#allocation30_spill] sm:$0xff] }
  0xcc   :  { %v1477_v63 = vpop.eup %1476 }
  0xcd   :  { %v277_v54 = vmul.f32 %v1477_v63, %v270_v38  ;;  %v2875_v63 = vld [vmem:[#allocation24_spill] sm:$0xff]  ;;  %v2876_v38 = vld [vmem:[#allocation25_spill] sm:$0xff] }
  0xcf   :  { %278 = vst [vmem:[%s2702_s5] sm:$0xff] %v277_v54  ;;  %304 = vmatmul.f32.vlgmr.msrb.gmra.mxu0 %v277_v54  ;;  %324 = vmatmul.f32.vlgmr.msrb.gmra.mxu1 %v277_v54 }
  0xd0   :  { %344 = vmatmul.f32.vlgmr.msrb.gmra.mxu2 %v277_v54  ;;  %364 = vmatmul.f32.vlgmr.msrb.gmra.mxu3 %v277_v54  ;;  %v2877_v54 = vld [vmem:[#allocation26_spill] sm:$0xff] }
  0xd1   :  { %604 = vmatpush.msrb.mxu0 %v2849_v59  ;;  %624 = vmatpush.msrb.mxu1 %v1728_v1 }
  0xd2   :  { %644 = vmatpush.msrb.mxu2 %v1730_v2  ;;  %664 = vmatpush.msrb.mxu3 %v1772_v17 }
  0xd3   :  { %605 = vmatpush.msrb.mxu0 %v1734_v3  ;;  %625 = vmatpush.msrb.mxu1 %v1736_v4 }
  0xd4   :  { %645 = vmatpush.msrb.mxu2 %v1738_v5  ;;  %665 = vmatpush.msrb.mxu3 %v1778_v19 }
  0xd5   :  { %606 = vmatpush.msrb.mxu0 %v1741_v6  ;;  %626 = vmatpush.msrb.mxu1 %v1743_v7 }
  0xd6   :  { %646 = vmatpush.msrb.mxu2 %v1747_v8  ;;  %666 = vmatpush.msrb.mxu3 %v1790_v23 }
  0xd7   :  { %607 = vmatpush.msrb.mxu0 %v1750_v9  ;;  %627 = vmatpush.msrb.mxu1 %v1752_v10 }
  0xd8   :  { %647 = vmatpush.msrb.mxu2 %v1756_v11  ;;  %667 = vmatpush.msrb.mxu3 %v1802_v27 }
  0xd9   :  { %608 = vmatpush.msrb.mxu0 %v1759_v12  ;;  %628 = vmatpush.msrb.mxu1 %v1761_v13 }
  0xda   :  { %648 = vmatpush.msrb.mxu2 %v1765_v14  ;;  %668 = vmatpush.msrb.mxu3 %v1814_v31 }
  0xdb   :  { %609 = vmatpush.msrb.mxu0 %v1768_v15  ;;  %629 = vmatpush.msrb.mxu1 %v1770_v16 }
  0xdc   :  { %649 = vmatpush.msrb.mxu2 %v1776_v18  ;;  %669 = vmatpush.msrb.mxu3 %v1826_v35 }
  0xdd   :  { %610 = vmatpush.msrb.mxu0 %v1781_v20  ;;  %630 = vmatpush.msrb.mxu1 %v1783_v21 }
  0xde   :  { %650 = vmatpush.msrb.mxu2 %v1788_v22  ;;  %670 = vmatpush.msrb.mxu3 %v1838_v39 }
  0xdf   :  { %611 = vmatpush.msrb.mxu0 %v1793_v24  ;;  %631 = vmatpush.msrb.mxu1 %v1795_v25 }
  0xe0   :  { %651 = vmatpush.msrb.mxu2 %v1800_v26  ;;  %671 = vmatpush.msrb.mxu3 %v1850_v43 }
  0xe1   :  { %612 = vmatpush.msrb.mxu0 %v1805_v28  ;;  %632 = vmatpush.msrb.mxu1 %v1807_v29 }
  0xe2   :  { %652 = vmatpush.msrb.mxu2 %v1812_v30  ;;  %672 = vmatpush.msrb.mxu3 %v1862_v47 }
  0xe3   :  { %613 = vmatpush.msrb.mxu0 %v1817_v32  ;;  %633 = vmatpush.msrb.mxu1 %v1819_v33 }
  0xe4   :  { %653 = vmatpush.msrb.mxu2 %v1824_v34  ;;  %673 = vmatpush.msrb.mxu3 %v2854_v36 }
  0xe5   :  { %614 = vmatpush.msrb.mxu0 %v2855_v37  ;;  %634 = vmatpush.msrb.mxu1 %v2856_v58 }
  0xe6   :  { %654 = vmatpush.msrb.mxu2 %v2857_v44  ;;  %674 = vmatpush.msrb.mxu3 %v2858_v52 }
  0xe7   :  { %615 = vmatpush.msrb.mxu0 %v2859_v49  ;;  %635 = vmatpush.msrb.mxu1 %v2860_v46 }
  0xe8   :  { %655 = vmatpush.msrb.mxu2 %v2861_v45  ;;  %675 = vmatpush.msrb.mxu3 %v2862_v48 }
  0xe9   :  { %616 = vmatpush.msrb.mxu0 %v2863_v60  ;;  %636 = vmatpush.msrb.mxu1 %v2864_v61  ;;  %v2881_v61 = vld [vmem:[#allocation33_spill] sm:$0xff] }
  0xea   :  { %656 = vmatpush.msrb.mxu2 %v2865_v62  ;;  %676 = vmatpush.msrb.mxu3 %v2866_v57 }
  0xeb   :  { %617 = vmatpush.msrb.mxu0 %v2867_v53  ;;  %637 = vmatpush.msrb.mxu1 %v2868_v42  ;;  %v2878_v53 = vld [vmem:[#allocation31_spill] sm:$0xff] }
  0xec   :  { %657 = vmatpush.msrb.mxu2 %v2869_v0  ;;  %677 = vmatpush.msrb.mxu3 %v2870_v40  ;;  %v1403_v40 = vld [vmem:[%s2697_s0 + $0x20] sm:$0xff]  ;;  %v2880_v0 = vld [vmem:[#allocation32_spill] sm:$0xff] }
  0xed   :  { %618 = vmatpush.msrb.mxu0 %v2871_v41  ;;  %638 = vmatpush.msrb.mxu1 %v2872_v56  ;;  %v1404_v56 = vld [vmem:[%s2697_s0 + $0x28] sm:$0xff]  ;;  %v2879_v41 = vld [vmem:[#allocation5_spill] sm:$0xff] }
  0xee   :  { %658 = vmatpush.msrb.mxu2 %v2873_v55  ;;  %678 = vmatpush.msrb.mxu3 %v2874_v50  ;;  %v284_v55 = vadd.f32 %v1403_v40, %v2879_v41  ;;  %v285_v50 = vadd.f32 %v1404_v56, %v2880_v0 }
  0xef   :  { %619 = vmatpush.msrb.mxu0 %v2875_v63  ;;  %639 = vmatpush.msrb.mxu1 %v2876_v38 }
  0xf0   :  { %659 = vmatpush.msrb.mxu2 %v2877_v54  ;;  %679 = vmatpush.msrb.mxu3 %v2878_v53  ;;  %v1405_v53 = vld [vmem:[%s2697_s0 + $0x30] sm:$0xff] }
  0xf1   :  { %v286_v60 = vadd.f32 %v1405_v53, %v2881_v61 }
 0x14c   :  { %v305_v42 = vpop.f32.mrf.mxu0  ;;  %v325_v63 = vpop.f32.mrf.mxu1 }
 0x14d   :  { %v368_v57 = vadd.f32 %v305_v42, %v284_v55  ;;  %v369_v38 = vadd.f32 %v325_v63, %v285_v50  ;;  %v1406_v42 = vld [vmem:[%s2697_s0 + $0x38] sm:$0xff] }
 0x14f   :  { %v1407_v54 = vmul.f32 -1.442695, %v368_v57  ;;  %v1408_v62 = vmul.f32 -1.442695, %v369_v38  ;;  %v2882_v57 = vld [vmem:[#allocation34_spill] sm:$0xff] }
 0x150   :  { %v287_v55 = vadd.f32 %v1406_v42, %v2882_v57 }
 0x151   :  { %1478 = vpow2.f32 %v1407_v54 }
 0x152   :  { %1480 = vpow2.f32 %v1408_v62 }
 0x153   :  { %v345_v48 = vpop.f32.mrf.mxu2  ;;  %v365_v50 = vpop.f32.mrf.mxu3 }
 0x154   :  { %v370_v45 = vadd.f32 %v345_v48, %v286_v60  ;;  %v371_v38 = vadd.f32 %v365_v50, %v287_v55 }
 0x156   :  { %v1409_v46 = vmul.f32 -1.442695, %v370_v45 }
 0x157   :  { %v1479_v40 = vpop.eup %1478 }
 0x158   :  { %v1481_v41 = vpop.eup %1480  ;;  %v381_v56 = vadd.f32 1.0, %v1479_v40  ;;  %1482 = vpow2.f32 %v1409_v46 }
 0x159   :  { %v382_v0 = vadd.f32 1.0, %v1481_v41 }
 0x15a   :  { %1484 = vrcp.f32 %v381_v56  ;;  %v395_v41 = vand.u32 2147483648, %v381_v56  ;;  %v393_v49 = vand.u32 2147483647, %v381_v56  ;;  %vm389_vm14 = vweird.f32 %v381_v56 }
 0x15b   :  { %1486 = vrcp.f32 %v382_v0  ;;  %v410_v40 = vand.u32 2147483648, %v382_v0  ;;  %v408_v42 = vand.u32 2147483647, %v382_v0  ;;  %vm404_vm15 = vweird.f32 %v382_v0 }
 0x15c   :  { %v396_v50 = vor.u32 1.1754944e-38, %v395_v41  ;;  %vm394_vm2 = vcmp.eq.f32.partialorder %v393_v49, 8.507059e+37 }
 0x15d   :  { %vm409_vm3 = vcmp.eq.f32.partialorder %v408_v42, 8.507059e+37 }
 0x15e   :  { %v1483_v53 = vpop.eup %1482 }
 0x15f   :  { %v383_v63 = vadd.f32 1.0, %v1483_v53 }
 0x160   :  { %v1485_v62 = vpop.eup %1484 }
 0x161   :  { %v1487_v48 = vpop.eup %1486  ;;  %v385_v45 = vmul.f32 %v1485_v62, %v381_v56  ;;  %1488 = vrcp.f32 %v383_v63  ;;  %vm390_vm12 = vweird.f32 %v1485_v62  ;;  %v425_v41 = vand.u32 2147483648, %v383_v63 }
 0x162   :  { %v400_v60 = vmul.f32 %v1487_v48, %v382_v0  ;;  %1490 = vtanh.f32 %v371_v38  ;;  %vm405_vm13 = vweird.f32 %v1487_v48  ;;  %vm391_vm0 = vmor %vm389_vm14, %vm390_vm12  ;;  %vm419_vm5 = vweird.f32 %v383_v63 }
 0x163   :  { %v386_v54 = vsub.f32 1.0, %v385_v45  ;;  %vm406_vm1 = vmor %vm404_vm15, %vm405_vm13  ;;  %v411_v45 = vor.u32 1.1754944e-38, %v410_v40  ;;  %v426_v49 = vor.u32 1.1754944e-38, %v425_v41 }
 0x164   :  { %v401_v46 = vsub.f32 1.0, %v400_v60 }
 0x165   :  { %v387_v61 = vmul.f32 %v1485_v62, %v386_v54 }
 0x166   :  { %v402_v52 = vmul.f32 %v1487_v48, %v401_v46 }
 0x167   :  { %v1489_v57 = vpop.eup %1488  ;;  %v388_v44 = vadd.f32 %v1485_v62, %v387_v61 }
 0x168   :  { %v415_v55 = vmul.f32 %v1489_v57, %v383_v63  ;;  %v403_v53 = vadd.f32 %v1487_v48, %v402_v52  ;;  %v1491_v38 = vpop.eup %1490  ;;  %vm420_vm4 = vweird.f32 %v1489_v57 }
 0x169   :  { %v392_v60 = vsel %vm391_vm0, %v1485_v62, %v388_v44  ;;  %v423_v44 = vand.u32 2147483647, %v383_v63  ;;  %vm421_vm6 = vmor %vm419_vm5, %vm420_vm4 }
 0x16a   :  { %v416_v58 = vsub.f32 1.0, %v415_v55  ;;  %v397_v54 = vsel %vm394_vm2, %v396_v50, %v392_v60  ;;  %v407_v37 = vsel %vm406_vm1, %v1487_v48, %v403_v53  ;;  %v1414_v53 = vld [vmem:[%s2697_s0 + $0x58] sm:$0xff] }
 0x16b   :  { %v412_v46 = vsel %vm409_vm3, %v411_v45, %v407_v37  ;;  %v431_v36 = vmul.f32 %v1491_v38, %v397_v54  ;;  %vm424_vm7 = vcmp.eq.f32.partialorder %v423_v44, 8.507059e+37  ;;  %v2912_v45 = vld [vmem:[#allocation34_spill] sm:$0xff] }
 0x16c   :  { %v417_v34 = vmul.f32 %v1489_v57, %v416_v58  ;;  %v430_v61 = vmul.f32 %v412_v46, %v2079_v51  ;;  %v445_v60 = vadd.f32 %v1414_v53, %v2912_v45  ;;  %v2313_v53 = vld [vmem:[#allocation2 + $0x170] sm:$0xff] }
 0x16e   :  { %v2166_v56 = vadd.f32 %v431_v36, %v430_v61  ;;  %v418_v0 = vadd.f32 %v1489_v57, %v417_v34 }
 0x170   :  { %1492 = vtanh.f32 %v2166_v56  ;;  %v422_v52 = vsel %vm421_vm6, %v1489_v57, %v418_v0 }
 0x171   :  { %v427_v48 = vsel %vm424_vm7, %v426_v49, %v422_v52 }
 0x176   :  { %v1493_v62 = vpop.eup %1492 }
 0x177   :  { %v434_v37 = vmul.f32 %v1493_v62, %v427_v48 }
 0x179   :  { %1410 = vst [vmem:[%s2702_s5 + $0x8] sm:$0xff] %v434_v37  ;;  %462 = vmatmul.f32.vlgmr.msra.gmra.mxu0 %v434_v37  ;;  %482 = vmatmul.f32.vlgmr.msra.gmra.mxu1 %v434_v37 }
 0x17a   :  { %502 = vmatmul.f32.vlgmr.msra.gmra.mxu2 %v434_v37  ;;  %522 = vmatmul.f32.vlgmr.msra.gmra.mxu3 %v434_v37 }
 0x17b   :  { %762 = vmatpush.msra.mxu0 %v2849_v59  ;;  %782 = vmatpush.msra.mxu1 %v1728_v1  ;;  %v2883_v1 = vld [vmem:[#allocation6_spill] sm:$0xff]  ;;  %v2911_v59 = vld [vmem:[#allocation33_spill] sm:$0xff] }
 0x17c   :  { %802 = vmatpush.msra.mxu2 %v1730_v2  ;;  %822 = vmatpush.msra.mxu3 %v1772_v17  ;;  %v2884_v2 = vld [vmem:[#allocation19_spill] sm:$0xff]  ;;  %v2899_v17 = vld [vmem:[#allocation18_spill] sm:$0xff] }
 0x17d   :  { %763 = vmatpush.msra.mxu0 %v1734_v3  ;;  %783 = vmatpush.msra.mxu1 %v1736_v4  ;;  %v2885_v3 = vld [vmem:[#allocation7_spill] sm:$0xff]  ;;  %v2886_v4 = vld [vmem:[#allocation8_spill] sm:$0xff] }
 0x17e   :  { %803 = vmatpush.msra.mxu2 %v1738_v5  ;;  %823 = vmatpush.msra.mxu3 %v1778_v19  ;;  %v2887_v5 = vld [vmem:[#allocation9_spill] sm:$0xff]  ;;  %v2901_v19 = vld [vmem:[#allocation20_spill] sm:$0xff] }
 0x17f   :  { %764 = vmatpush.msra.mxu0 %v1741_v6  ;;  %784 = vmatpush.msra.mxu1 %v1743_v7  ;;  %v2888_v6 = vld [vmem:[#allocation23_spill] sm:$0xff]  ;;  %v2889_v7 = vld [vmem:[#allocation10_spill] sm:$0xff] }
 0x180   :  { %804 = vmatpush.msra.mxu2 %v1747_v8  ;;  %824 = vmatpush.msra.mxu3 %v1790_v23  ;;  %v2890_v8 = vld [vmem:[#allocation11_spill] sm:$0xff]  ;;  %v2905_v23 = vld [vmem:[#allocation24_spill] sm:$0xff] }
 0x181   :  { %765 = vmatpush.msra.mxu0 %v1750_v9  ;;  %785 = vmatpush.msra.mxu1 %v1752_v10  ;;  %v2891_v9 = vld [vmem:[#allocation12_spill] sm:$0xff]  ;;  %v2892_v10 = vld [vmem:[#allocation27_spill] sm:$0xff] }
 0x182   :  { %805 = vmatpush.msra.mxu2 %v1756_v11  ;;  %825 = vmatpush.msra.mxu3 %v1802_v27  ;;  %v2893_v11 = vld [vmem:[#allocation13_spill] sm:$0xff] }
 0x183   :  { %766 = vmatpush.msra.mxu0 %v1759_v12  ;;  %786 = vmatpush.msra.mxu1 %v1761_v13  ;;  %v2894_v12 = vld [vmem:[#allocation14_spill] sm:$0xff]  ;;  %v2895_v13 = vld [vmem:[#allocation15_spill] sm:$0xff]  ;;  %v1411_v27 = vld [vmem:[%s2697_s0 + $0x40] sm:$0xff] }
 0x184   :  { %806 = vmatpush.msra.mxu2 %v1765_v14  ;;  %826 = vmatpush.msra.mxu3 %v1814_v31  ;;  %v2896_v14 = vld [vmem:[#allocation28_spill] sm:$0xff] }
 0x185   :  { %767 = vmatpush.msra.mxu0 %v1768_v15  ;;  %787 = vmatpush.msra.mxu1 %v1770_v16  ;;  %v2897_v15 = vld [vmem:[#allocation16_spill] sm:$0xff]  ;;  %v2898_v16 = vld [vmem:[#allocation17_spill] sm:$0xff] }
 0x186   :  { %807 = vmatpush.msra.mxu2 %v1776_v18  ;;  %827 = vmatpush.msra.mxu3 %v1826_v35  ;;  %v2900_v18 = vld [vmem:[#allocation29_spill] sm:$0xff]  ;;  %v2910_v31 = vld [vmem:[#allocation32_spill] sm:$0xff] }
 0x187   :  { %768 = vmatpush.msra.mxu0 %v1781_v20  ;;  %788 = vmatpush.msra.mxu1 %v1783_v21  ;;  %v2902_v20 = vld [vmem:[#allocation21_spill] sm:$0xff]  ;;  %v2903_v21 = vld [vmem:[#allocation22_spill] sm:$0xff] }
 0x188   :  { %808 = vmatpush.msra.mxu2 %v1788_v22  ;;  %828 = vmatpush.msra.mxu3 %v1838_v39  ;;  %v2904_v22 = vld [vmem:[#allocation30_spill] sm:$0xff] }
 0x189   :  { %769 = vmatpush.msra.mxu0 %v1793_v24  ;;  %789 = vmatpush.msra.mxu1 %v1795_v25  ;;  %v2906_v24 = vld [vmem:[#allocation25_spill] sm:$0xff]  ;;  %v2907_v25 = vld [vmem:[#allocation26_spill] sm:$0xff] }
 0x18a   :  { %809 = vmatpush.msra.mxu2 %v1800_v26  ;;  %829 = vmatpush.msra.mxu3 %v1850_v43  ;;  %v2908_v26 = vld [vmem:[#allocation31_spill] sm:$0xff] }
 0x18b   :  { %770 = vmatpush.msra.mxu0 %v1805_v28  ;;  %790 = vmatpush.msra.mxu1 %v1807_v29  ;;  %v1412_v28 = vld [vmem:[%s2697_s0 + $0x48] sm:$0xff]  ;;  %v2909_v29 = vld [vmem:[#allocation5_spill] sm:$0xff]  ;;  %v1413_v43 = vld [vmem:[%s2697_s0 + $0x50] sm:$0xff] }
 0x18c   :  { %810 = vmatpush.msra.mxu2 %v1812_v30  ;;  %830 = vmatpush.msra.mxu3 %v1862_v47  ;;  %v442_v30 = vadd.f32 %v1411_v27, %v2909_v29  ;;  %v444_v36 = vadd.f32 %v1413_v43, %v2911_v59  ;;  %v2280_v43 = vld [vmem:[#allocation2 + $0x1d8] sm:$0xff] }
 0x18d   :  { %771 = vmatpush.msra.mxu0 %v1817_v32  ;;  %791 = vmatpush.msra.mxu1 %v1819_v33  ;;  %v443_v32 = vadd.f32 %v1412_v28, %v2910_v31 }
 0x18e   :  { %811 = vmatpush.msra.mxu2 %v2883_v1  ;;  %831 = vmatpush.msra.mxu3 %v2884_v2 }
 0x18f   :  { %772 = vmatpush.msra.mxu0 %v2885_v3  ;;  %792 = vmatpush.msra.mxu1 %v2886_v4 }
 0x190   :  { %812 = vmatpush.msra.mxu2 %v2887_v5  ;;  %832 = vmatpush.msra.mxu3 %v2888_v6 }
 0x191   :  { %773 = vmatpush.msra.mxu0 %v2889_v7  ;;  %793 = vmatpush.msra.mxu1 %v2890_v8 }
 0x192   :  { %813 = vmatpush.msra.mxu2 %v2891_v9  ;;  %833 = vmatpush.msra.mxu3 %v2892_v10 }
 0x193   :  { %774 = vmatpush.msra.mxu0 %v2893_v11  ;;  %794 = vmatpush.msra.mxu1 %v2894_v12 }
 0x194   :  { %814 = vmatpush.msra.mxu2 %v2895_v13  ;;  %834 = vmatpush.msra.mxu3 %v2896_v14 }
 0x195   :  { %775 = vmatpush.msra.mxu0 %v2897_v15  ;;  %795 = vmatpush.msra.mxu1 %v2898_v16 }
 0x196   :  { %815 = vmatpush.msra.mxu2 %v2899_v17  ;;  %835 = vmatpush.msra.mxu3 %v2900_v18 }
 0x197   :  { %776 = vmatpush.msra.mxu0 %v2901_v19  ;;  %796 = vmatpush.msra.mxu1 %v2902_v20 }
 0x198   :  { %816 = vmatpush.msra.mxu2 %v2903_v21  ;;  %836 = vmatpush.msra.mxu3 %v2904_v22 }
 0x199   :  { %777 = vmatpush.msra.mxu0 %v2905_v23  ;;  %797 = vmatpush.msra.mxu1 %v2906_v24 }
 0x19a   :  { %817 = vmatpush.msra.mxu2 %v2907_v25  ;;  %837 = vmatpush.msra.mxu3 %v2908_v26 }
 0x1f6   :  { %v463_v33 = vpop.f32.mrf.mxu0  ;;  %v483_v34 = vpop.f32.mrf.mxu1 }
 0x1f7   :  { %v526_v35 = vadd.f32 %v463_v33, %v442_v30  ;;  %v527_v39 = vadd.f32 %v483_v34, %v443_v32  ;;  %v2262_v30 = vld [vmem:[#allocation2 + $0x1e8] sm:$0xff]  ;;  %v2265_v32 = vld [vmem:[#allocation2 + $0x1f0] sm:$0xff]  ;;  %v2268_v33 = vld [vmem:[#allocation2 + $0x1f8] sm:$0xff] }
 0x1f8   :  { %v2271_v34 = vld [vmem:[#allocation2 + $0x1c0] sm:$0xff] }
 0x1f9   :  { %v1415_v47 = vmul.f32 -1.442695, %v526_v35  ;;  %v1416_v51 = vmul.f32 -1.442695, %v527_v39  ;;  %v2274_v35 = vld [vmem:[#allocation2 + $0x1c8] sm:$0xff]  ;;  %v2277_v39 = vld [vmem:[#allocation2 + $0x1d0] sm:$0xff] }
 0x1fb   :  { %1494 = vpow2.f32 %v1415_v47  ;;  %v2283_v47 = vld [vmem:[#allocation2 + $0x1a0] sm:$0xff] }
 0x1fc   :  { %1496 = vpow2.f32 %v1416_v51  ;;  %v2286_v51 = vld [vmem:[#allocation2 + $0x1a8] sm:$0xff] }
 0x1fd   :  { %v503_v58 = vpop.f32.mrf.mxu2  ;;  %v523_v38 = vpop.f32.mrf.mxu3 }
 0x1fe   :  { %v528_v57 = vadd.f32 %v503_v58, %v444_v36  ;;  %v529_v0 = vadd.f32 %v523_v38, %v445_v60  ;;  %v2289_v36 = vld [vmem:[#allocation2 + $0x1b0] sm:$0xff]  ;;  %v2292_v58 = vld [vmem:[#allocation2 + $0x1b8] sm:$0xff]  ;;  %v2319_v38 = vld [vmem:[#allocation2 + $0x140] sm:$0xff] }
 0x1ff   :  { %v2316_v60 = vld [vmem:[#allocation2 + $0x178] sm:$0xff] }
 0x200   :  { %v1417_v63 = vmul.f32 -1.442695, %v528_v57  ;;  %v2295_v57 = vld [vmem:[#allocation2 + $0x180] sm:$0xff] }
 0x201   :  { %v1495_v40 = vpop.eup %1494 }
 0x202   :  { %v1497_v42 = vpop.eup %1496  ;;  %v539_v55 = vadd.f32 1.0, %v1495_v40  ;;  %1498 = vpow2.f32 %v1417_v63  ;;  %v2298_v63 = vld [vmem:[#allocation2 + $0x188] sm:$0xff]  ;;  %v2301_v40 = vld [vmem:[#allocation2 + $0x190] sm:$0xff] }
 0x203   :  { %v540_v50 = vadd.f32 1.0, %v1497_v42  ;;  %v2304_v42 = vld [vmem:[#allocation2 + $0x198] sm:$0xff] }
 0x204   :  { %1500 = vrcp.f32 %v539_v55  ;;  %v553_v48 = vand.u32 2147483648, %v539_v55  ;;  %v551_v2 = vand.u32 2147483647, %v539_v55  ;;  %vm547_vm10 = vweird.f32 %v539_v55 }
 0x205   :  { %1502 = vrcp.f32 %v540_v50  ;;  %v568_v37 = vand.u32 2147483648, %v540_v50  ;;  %v566_v4 = vand.u32 2147483647, %v540_v50  ;;  %vm562_vm11 = vweird.f32 %v540_v50 }
 0x206   :  { %v554_v8 = vor.u32 1.1754944e-38, %v553_v48  ;;  %vm552_vm14 = vcmp.eq.f32.partialorder %v551_v2, 8.507059e+37  ;;  %v2349_v48 = vld [vmem:[#allocation2 + $0x110] sm:$0xff]  ;;  %v2358_v2 = vld [vmem:[#allocation2 + $0xe8] sm:$0xff] }
 0x207   :  { %v569_v10 = vor.u32 1.1754944e-38, %v568_v37  ;;  %vm567_vm15 = vcmp.eq.f32.partialorder %v566_v4, 8.507059e+37  ;;  %v2352_v37 = vld [vmem:[#allocation2 + $0x118] sm:$0xff] }
 0x208   :  { %v1499_v54 = vpop.eup %1498  ;;  %v2364_v4 = vld [vmem:[#allocation2 + $0xf8] sm:$0xff] }
 0x209   :  { %v541_v46 = vadd.f32 1.0, %v1499_v54  ;;  %v2322_v54 = vld [vmem:[#allocation2 + $0x148] sm:$0xff] }
 0x20a   :  { %v1501_v61 = vpop.eup %1500 }
 0x20b   :  { %v1503_v41 = vpop.eup %1502  ;;  %v543_v44 = vmul.f32 %v1501_v61, %v539_v55  ;;  %1504 = vrcp.f32 %v541_v46  ;;  %vm548_vm8 = vweird.f32 %v1501_v61  ;;  %v583_v22 = vand.u32 2147483648, %v541_v46  ;;  %v2307_v55 = vld [vmem:[#allocation2 + $0x160] sm:$0xff] }
 0x20c   :  { %v558_v52 = vmul.f32 %v1503_v41, %v540_v50  ;;  %1506 = vtanh.f32 %v529_v0  ;;  %vm563_vm9 = vweird.f32 %v1503_v41  ;;  %vm549_vm12 = vmor %vm547_vm10, %vm548_vm8  ;;  %vm577_vm1 = vweird.f32 %v541_v46  ;;  %v2310_v50 = vld [vmem:[#allocation2 + $0x168] sm:$0xff]  ;;  %v2331_v0 = vld [vmem:[#allocation2 + $0x120] sm:$0xff] }
 0x20d   :  { %v544_v49 = vsub.f32 1.0, %v543_v44  ;;  %vm564_vm13 = vmor %vm562_vm11, %vm563_vm9  ;;  %v581_v23 = vand.u32 2147483647, %v541_v46  ;;  %v584_v25 = vor.u32 1.1754944e-38, %v583_v22  ;;  %v2337_v44 = vld [vmem:[#allocation2 + $0x130] sm:$0xff]  ;;  %v2415_v22 = vld [vmem:[#allocation2 + $0x40] sm:$0xff] }
 0x20e   :  { %v559_v62 = vsub.f32 1.0, %v558_v52  ;;  %v2340_v52 = vld [vmem:[#allocation2 + $0x138] sm:$0xff]  ;;  %2927 = vst [vmem:[#allocation16_spill] sm:$0xff] %v2415_v22 }
 0x20f   :  { %v545_v1 = vmul.f32 %v1501_v61, %v544_v49  ;;  %vm582_vm3 = vcmp.eq.f32.partialorder %v581_v23, 8.507059e+37  ;;  %v2343_v49 = vld [vmem:[#allocation2 + $0x100] sm:$0xff]  ;;  %v2418_v23 = vld [vmem:[#allocation2 + $0x48] sm:$0xff] }
 0x210   :  { %v560_v3 = vmul.f32 %v1503_v41, %v559_v62  ;;  %v2346_v62 = vld [vmem:[#allocation2 + $0x108] sm:$0xff]  ;;  %2928 = vst [vmem:[#allocation17_spill] sm:$0xff] %v2418_v23 }
 0x211   :  { %v1505_v5 = vpop.eup %1504  ;;  %v546_v6 = vadd.f32 %v1501_v61, %v545_v1  ;;  %v2355_v1 = vld [vmem:[#allocation2 + $0xe0] sm:$0xff] }
 0x212   :  { %v573_v7 = vmul.f32 %v1505_v5, %v541_v46  ;;  %v561_v9 = vadd.f32 %v1503_v41, %v560_v3  ;;  %v1507_v12 = vpop.eup %1506  ;;  %vm578_vm0 = vweird.f32 %v1505_v5  ;;  %v2325_v46 = vld [vmem:[#allocation2 + $0x150] sm:$0xff] }
 0x213   :  { %v550_v11 = vsel %vm549_vm12, %v1501_v61, %v546_v6  ;;  %vm579_vm2 = vmor %vm577_vm1, %vm578_vm0  ;;  %v2328_v61 = vld [vmem:[#allocation2 + $0x158] sm:$0xff]  ;;  %v2361_v3 = vld [vmem:[#allocation2 + $0xf0] sm:$0xff] }
 0x214   :  { %v574_v13 = vsub.f32 1.0, %v573_v7  ;;  %v555_v14 = vsel %vm552_vm14, %v554_v8, %v550_v11  ;;  %v565_v15 = vsel %vm564_vm13, %v1503_v41, %v561_v9  ;;  %v2334_v41 = vld [vmem:[#allocation2 + $0x128] sm:$0xff]  ;;  %v2373_v7 = vld [vmem:[#allocation2 + $0xd0] sm:$0xff]  ;;  %v2376_v8 = vld [vmem:[#allocation2 + $0xd8] sm:$0xff] }
 0x215   :  { %v570_v16 = vsel %vm567_vm15, %v569_v10, %v565_v15  ;;  %v589_v17 = vmul.f32 %v1507_v12, %v555_v14  ;;  %v2370_v6 = vld [vmem:[#allocation2 + $0xc8] sm:$0xff]  ;;  %2913 = vst [vmem:[#allocation6_spill] sm:$0xff] %v2373_v7  ;;  %v2379_v9 = vld [vmem:[#allocation2 + $0xa0] sm:$0xff]  ;;  %v2385_v11 = vld [vmem:[#allocation2 + $0xb0] sm:$0xff] }
 0x216   :  { %v575_v18 = vmul.f32 %v1505_v5, %v574_v13  ;;  %v588_v19 = vmul.f32 %v570_v16, %v2166_v56  ;;  %v2259_v56 = vld [vmem:[#allocation2 + $0x1e0] sm:$0xff]  ;;  %2914 = vst [vmem:[#allocation19_spill] sm:$0xff] %v2376_v8  ;;  %v2382_v10 = vld [vmem:[#allocation2 + $0xa8] sm:$0xff]  ;;  %v2388_v12 = vld [vmem:[#allocation2 + $0xb8] sm:$0xff] }
 0x217   :  { %2915 = vst [vmem:[#allocation7_spill] sm:$0xff] %v2379_v9  ;;  %v2391_v13 = vld [vmem:[#allocation2 + $0x80] sm:$0xff]  ;;  %v2394_v14 = vld [vmem:[#allocation2 + $0x88] sm:$0xff]  ;;  %v2397_v15 = vld [vmem:[#allocation2 + $0x90] sm:$0xff] }
 0x218   :  { %v2253_v20 = vadd.f32 %v589_v17, %v588_v19  ;;  %v576_v21 = vadd.f32 %v1505_v5, %v575_v18  ;;  %2916 = vst [vmem:[#allocation8_spill] sm:$0xff] %v2382_v10  ;;  %v2400_v16 = vld [vmem:[#allocation2 + $0x98] sm:$0xff]  ;;  %v2403_v17 = vld [vmem:[#allocation2 + $0x60] sm:$0xff]  ;;  %v2406_v18 = vld [vmem:[#allocation2 + $0x68] sm:$0xff] }
 0x219   :  { %2917 = vst [vmem:[#allocation9_spill] sm:$0xff] %v2385_v11  ;;  %v2409_v19 = vld [vmem:[#allocation2 + $0x70] sm:$0xff] }
 0x21a   :  { %1508 = vtanh.f32 %v2253_v20  ;;  %v580_v24 = vsel %vm579_vm2, %v1505_v5, %v576_v21  ;;  %v2367_v5 = vld [vmem:[#allocation2 + $0xc0] sm:$0xff]  ;;  %2918 = vst [vmem:[#allocation23_spill] sm:$0xff] %v2388_v12  ;;  %v2412_v21 = vld [vmem:[#allocation2 + $0x78] sm:$0xff] }
 0x21b   :  { %v585_v27 = vsel %vm582_vm3, %v584_v25, %v580_v24  ;;  %2919 = vst [vmem:[#allocation10_spill] sm:$0xff] %v2391_v13  ;;  %v2421_v24 = vld [vmem:[#allocation2 + $0x50] sm:$0xff]  ;;  %v2424_v25 = vld [vmem:[#allocation2 + $0x58] sm:$0xff] }
 0x21c   :  { %2920 = vst [vmem:[#allocation11_spill] sm:$0xff] %v2394_v14 }
 0x21d   :  { %2921 = vst [vmem:[#allocation12_spill] sm:$0xff] %v2397_v15 }
 0x21e   :  { %2922 = vst [vmem:[#allocation27_spill] sm:$0xff] %v2400_v16 }
 0x21f   :  { %2923 = vst [vmem:[#allocation13_spill] sm:$0xff] %v2403_v17 }
 0x220   :  { %v1509_v26 = vpop.eup %1508  ;;  %2924 = vst [vmem:[#allocation14_spill] sm:$0xff] %v2406_v18 }
 0x221   :  { %v592_v28 = vmul.f32 %v1509_v26, %v585_v27  ;;  %2925 = vst [vmem:[#allocation15_spill] sm:$0xff] %v2409_v19  ;;  %v2427_v26 = vld [vmem:[#allocation2 + $0x20] sm:$0xff]  ;;  %v2430_v27 = vld [vmem:[#allocation2 + $0x28] sm:$0xff] }
 0x222   :  { %2926 = vst [vmem:[#allocation28_spill] sm:$0xff] %v2412_v21 }
 0x223   :  { %1418 = vst [vmem:[%s2702_s5 + $0x10] sm:$0xff] %v592_v28  ;;  %620 = vmatmul.f32.vlgmr.msrb.gmra.mxu0 %v592_v28  ;;  %640 = vmatmul.f32.vlgmr.msrb.gmra.mxu1 %v592_v28 }
 0x224   :  { %660 = vmatmul.f32.vlgmr.msrb.gmra.mxu2 %v592_v28  ;;  %680 = vmatmul.f32.vlgmr.msrb.gmra.mxu3 %v592_v28  ;;  %2929 = vst [vmem:[#allocation18_spill] sm:$0xff] %v2421_v24  ;;  %v2433_v28 = vld [vmem:[#allocation2 + $0x30] sm:$0xff] }
 0x225   :  { %920 = vmatpush.msrb.mxu0 %v2259_v56  ;;  %940 = vmatpush.msrb.mxu1 %v2262_v30  ;;  %2930 = vst [vmem:[#allocation29_spill] sm:$0xff] %v2424_v25 }
 0x226   :  { %960 = vmatpush.msrb.mxu2 %v2265_v32  ;;  %980 = vmatpush.msrb.mxu3 %v2268_v33  ;;  %2931 = vst [vmem:[#allocation20_spill] sm:$0xff] %v2427_v26 }
 0x227   :  { %921 = vmatpush.msrb.mxu0 %v2271_v34  ;;  %941 = vmatpush.msrb.mxu1 %v2274_v35  ;;  %2932 = vst [vmem:[#allocation21_spill] sm:$0xff] %v2430_v27 }
 0x228   :  { %961 = vmatpush.msrb.mxu2 %v2277_v39  ;;  %981 = vmatpush.msrb.mxu3 %v2280_v43  ;;  %2933 = vst [vmem:[#allocation22_spill] sm:$0xff] %v2433_v28 }
 0x229   :  { %922 = vmatpush.msrb.mxu0 %v2283_v47  ;;  %942 = vmatpush.msrb.mxu1 %v2286_v51 }
 0x22a   :  { %962 = vmatpush.msrb.mxu2 %v2289_v36  ;;  %982 = vmatpush.msrb.mxu3 %v2292_v58 }
 0x22b   :  { %923 = vmatpush.msrb.mxu0 %v2295_v57  ;;  %943 = vmatpush.msrb.mxu1 %v2298_v63 }
 0x22c   :  { %963 = vmatpush.msrb.mxu2 %v2301_v40  ;;  %983 = vmatpush.msrb.mxu3 %v2304_v42 }
 0x22d   :  { %924 = vmatpush.msrb.mxu0 %v2307_v55  ;;  %944 = vmatpush.msrb.mxu1 %v2310_v50 }
 0x22e   :  { %964 = vmatpush.msrb.mxu2 %v2313_v53  ;;  %984 = vmatpush.msrb.mxu3 %v2316_v60 }
 0x22f   :  { %925 = vmatpush.msrb.mxu0 %v2319_v38  ;;  %945 = vmatpush.msrb.mxu1 %v2322_v54 }
 0x230   :  { %965 = vmatpush.msrb.mxu2 %v2325_v46  ;;  %985 = vmatpush.msrb.mxu3 %v2328_v61 }
 0x231   :  { %926 = vmatpush.msrb.mxu0 %v2331_v0  ;;  %946 = vmatpush.msrb.mxu1 %v2334_v41 }
 0x232   :  { %966 = vmatpush.msrb.mxu2 %v2337_v44  ;;  %986 = vmatpush.msrb.mxu3 %v2340_v52 }
 0x233   :  { %927 = vmatpush.msrb.mxu0 %v2343_v49  ;;  %947 = vmatpush.msrb.mxu1 %v2346_v62 }
 0x234   :  { %967 = vmatpush.msrb.mxu2 %v2349_v48  ;;  %987 = vmatpush.msrb.mxu3 %v2352_v37 }
 0x235   :  { %928 = vmatpush.msrb.mxu0 %v2355_v1  ;;  %948 = vmatpush.msrb.mxu1 %v2358_v2 }
 0x236   :  { %968 = vmatpush.msrb.mxu2 %v2361_v3  ;;  %988 = vmatpush.msrb.mxu3 %v2364_v4 }
 0x237   :  { %929 = vmatpush.msrb.mxu0 %v2367_v5  ;;  %949 = vmatpush.msrb.mxu1 %v2370_v6 }
 0x238   :  { %969 = vmatpush.msrb.mxu2 %v2373_v7  ;;  %989 = vmatpush.msrb.mxu3 %v2376_v8 }
 0x239   :  { %930 = vmatpush.msrb.mxu0 %v2379_v9  ;;  %950 = vmatpush.msrb.mxu1 %v2382_v10 }
 0x23a   :  { %970 = vmatpush.msrb.mxu2 %v2385_v11  ;;  %990 = vmatpush.msrb.mxu3 %v2388_v12 }
 0x23b   :  { %931 = vmatpush.msrb.mxu0 %v2391_v13  ;;  %951 = vmatpush.msrb.mxu1 %v2394_v14 }
 0x23c   :  { %971 = vmatpush.msrb.mxu2 %v2397_v15  ;;  %991 = vmatpush.msrb.mxu3 %v2400_v16 }
 0x23d   :  { %932 = vmatpush.msrb.mxu0 %v2403_v17  ;;  %952 = vmatpush.msrb.mxu1 %v2406_v18 }
 0x23e   :  { %972 = vmatpush.msrb.mxu2 %v2409_v19  ;;  %992 = vmatpush.msrb.mxu3 %v2412_v21 }
 0x23f   :  { %933 = vmatpush.msrb.mxu0 %v2415_v22  ;;  %953 = vmatpush.msrb.mxu1 %v2418_v23  ;;  %v2436_v23 = vld [vmem:[#allocation2 + $0x38] sm:$0xff] }
 0x240   :  { %973 = vmatpush.msrb.mxu2 %v2421_v24  ;;  %993 = vmatpush.msrb.mxu3 %v2424_v25  ;;  %2934 = vst [vmem:[#allocation30_spill] sm:$0xff] %v2436_v23  ;;  %v2439_v24 = vld [vmem:[#allocation2] sm:$0xff]  ;;  %v2442_v25 = vld [vmem:[#allocation2 + $0x8] sm:$0xff] }
 0x241   :  { %934 = vmatpush.msrb.mxu0 %v2427_v26  ;;  %954 = vmatpush.msrb.mxu1 %v2430_v27  ;;  %2935 = vst [vmem:[#allocation24_spill] sm:$0xff] %v2439_v24  ;;  %v2445_v26 = vld [vmem:[#allocation2 + $0x10] sm:$0xff]  ;;  %v2448_v27 = vld [vmem:[#allocation2 + $0x18] sm:$0xff] }
 0x242   :  { %974 = vmatpush.msrb.mxu2 %v2433_v28  ;;  %994 = vmatpush.msrb.mxu3 %v2436_v23  ;;  %2936 = vst [vmem:[#allocation25_spill] sm:$0xff] %v2442_v25  ;;  %v1419_v23 = vld [vmem:[%s2697_s0 + $0x60] sm:$0xff] }
 0x243   :  { %935 = vmatpush.msrb.mxu0 %v2439_v24  ;;  %955 = vmatpush.msrb.mxu1 %v2442_v25  ;;  %2937 = vst [vmem:[#allocation26_spill] sm:$0xff] %v2445_v26  ;;  %v1420_v24 = vld [vmem:[%s2697_s0 + $0x68] sm:$0xff]  ;;  %v600_v28 = vadd.f32 %v1419_v23, %v2909_v29 }
 0x244   :  { %975 = vmatpush.msrb.mxu2 %v2445_v26  ;;  %2938 = vst [vmem:[#allocation31_spill] sm:$0xff] %v2448_v27  ;;  %995 = vmatpush.msrb.mxu3 %v2448_v27  ;;  %v601_v25 = vadd.f32 %v1420_v24, %v2910_v31  ;;  %v1421_v27 = vld [vmem:[%s2697_s0 + $0x70] sm:$0xff] }
 0x245   :  { %v602_v16 = vadd.f32 %v1421_v27, %v2911_v59 }
 0x2a0   :  { %v621_v22 = vpop.f32.mrf.mxu0  ;;  %v641_v21 = vpop.f32.mrf.mxu1 }
 0x2a1   :  { %v684_v19 = vadd.f32 %v621_v22, %v600_v28  ;;  %v685_v26 = vadd.f32 %v641_v21, %v601_v25  ;;  %v1422_v21 = vld [vmem:[%s2697_s0 + $0x78] sm:$0xff] }
 0x2a3   :  { %v1423_v18 = vmul.f32 -1.442695, %v684_v19  ;;  %v1424_v17 = vmul.f32 -1.442695, %v685_v26  ;;  %v603_v19 = vadd.f32 %v1422_v21, %v2912_v45 }
 0x2a5   :  { %1510 = vpow2.f32 %v1423_v18 }
 0x2a6   :  { %1512 = vpow2.f32 %v1424_v17 }
 0x2a7   :  { %v661_v15 = vpop.f32.mrf.mxu2  ;;  %v681_v22 = vpop.f32.mrf.mxu3 }
 0x2a8   :  { %v686_v14 = vadd.f32 %v661_v15, %v602_v16  ;;  %v687_v26 = vadd.f32 %v681_v22, %v603_v19 }
 0x2aa   :  { %v1425_v13 = vmul.f32 -1.442695, %v686_v14 }
 0x2ab   :  { %v1511_v23 = vpop.eup %1510 }
 0x2ac   :  { %v1513_v29 = vpop.eup %1512  ;;  %v697_v24 = vadd.f32 1.0, %v1511_v23  ;;  %1514 = vpow2.f32 %v1425_v13 }
 0x2ad   :  { %v698_v31 = vadd.f32 1.0, %v1513_v29 }
 0x2ae   :  { %1516 = vrcp.f32 %v697_v24  ;;  %v711_v29 = vand.u32 2147483648, %v697_v24  ;;  %v709_v59 = vand.u32 2147483647, %v697_v24  ;;  %vm705_vm6 = vweird.f32 %v697_v24 }
 0x2af   :  { %1518 = vrcp.f32 %v698_v31  ;;  %v726_v28 = vand.u32 2147483648, %v698_v31  ;;  %v724_v21 = vand.u32 2147483647, %v698_v31  ;;  %vm720_vm7 = vweird.f32 %v698_v31 }
 0x2b0   :  { %v712_v22 = vor.u32 1.1754944e-38, %v711_v29  ;;  %vm710_vm10 = vcmp.eq.f32.partialorder %v709_v59, 8.507059e+37 }
 0x2b1   :  { %vm725_vm11 = vcmp.eq.f32.partialorder %v724_v21, 8.507059e+37  ;;  %v2946_v21 = vld [vmem:[#allocation11_spill] sm:$0xff] }
 0x2b2   :  { %v1515_v25 = vpop.eup %1514 }
 0x2b3   :  { %v699_v18 = vadd.f32 1.0, %v1515_v25 }
 0x2b4   :  { %v1517_v17 = vpop.eup %1516 }
 0x2b5   :  { %v1519_v15 = vpop.eup %1518  ;;  %v701_v14 = vmul.f32 %v1517_v17, %v697_v24  ;;  %1520 = vrcp.f32 %v699_v18  ;;  %vm706_vm4 = vweird.f32 %v1517_v17  ;;  %v741_v29 = vand.u32 2147483648, %v699_v18 }
 0x2b6   :  { %v716_v16 = vmul.f32 %v1519_v15, %v698_v31  ;;  %1522 = vtanh.f32 %v687_v26  ;;  %vm721_vm5 = vweird.f32 %v1519_v15  ;;  %vm707_vm8 = vmor %vm705_vm6, %vm706_vm4  ;;  %vm735_vm13 = vweird.f32 %v699_v18 }
 0x2b7   :  { %v702_v27 = vsub.f32 1.0, %v701_v14  ;;  %vm722_vm9 = vmor %vm720_vm7, %vm721_vm5  ;;  %v727_v14 = vor.u32 1.1754944e-38, %v726_v28  ;;  %v2945_v28 = vld [vmem:[#allocation10_spill] sm:$0xff] }
 0x2b8   :  { %v717_v13 = vsub.f32 1.0, %v716_v16 }
 0x2b9   :  { %v703_v23 = vmul.f32 %v1517_v17, %v702_v27 }
 0x2ba   :  { %v718_v12 = vmul.f32 %v1519_v15, %v717_v13 }
 0x2bb   :  { %v1521_v45 = vpop.eup %1520  ;;  %v704_v11 = vadd.f32 %v1517_v17, %v703_v23 }
 0x2bc   :  { %v731_v19 = vmul.f32 %v1521_v45, %v699_v18  ;;  %v719_v25 = vadd.f32 %v1519_v15, %v718_v12  ;;  %v1523_v26 = vpop.eup %1522  ;;  %vm736_vm12 = vweird.f32 %v1521_v45  ;;  %v742_v12 = vor.u32 1.1754944e-38, %v741_v29  ;;  %v2957_v29 = vld [vmem:[#allocation20_spill] sm:$0xff] }
 0x2bd   :  { %v708_v16 = vsel %vm707_vm8, %v1517_v17, %v704_v11  ;;  %v739_v11 = vand.u32 2147483647, %v699_v18  ;;  %vm737_vm14 = vmor %vm735_vm13, %vm736_vm12  ;;  %v2944_v18 = vld [vmem:[#allocation23_spill] sm:$0xff] }
 0x2be   :  { %v732_v10 = vsub.f32 1.0, %v731_v19  ;;  %v713_v27 = vsel %vm710_vm10, %v712_v22, %v708_v16  ;;  %v723_v9 = vsel %vm722_vm9, %v1519_v15, %v719_v25  ;;  %v2947_v19 = vld [vmem:[#allocation12_spill] sm:$0xff]  ;;  %v2948_v22 = vld [vmem:[#allocation27_spill] sm:$0xff]  ;;  %v2949_v25 = vld [vmem:[#allocation13_spill] sm:$0xff] }
 0x2bf   :  { %v728_v13 = vsel %vm725_vm11, %v727_v14, %v723_v9  ;;  %v747_v8 = vmul.f32 %v1523_v26, %v713_v27  ;;  %vm740_vm15 = vcmp.eq.f32.partialorder %v739_v11, 8.507059e+37  ;;  %v2950_v14 = vld [vmem:[#allocation14_spill] sm:$0xff]  ;;  %v2951_v16 = vld [vmem:[#allocation15_spill] sm:$0xff]  ;;  %v2952_v26 = vld [vmem:[#allocation28_spill] sm:$0xff] }
 0x2c0   :  { %v733_v7 = vmul.f32 %v1521_v45, %v732_v10  ;;  %v746_v23 = vmul.f32 %v728_v13, %v2253_v20  ;;  %v2940_v20 = vld [vmem:[#allocation19_spill] sm:$0xff]  ;;  %v2943_v10 = vld [vmem:[#allocation9_spill] sm:$0xff]  ;;  %v2953_v27 = vld [vmem:[#allocation16_spill] sm:$0xff] }
 0x2c1   :  { %v2954_v13 = vld [vmem:[#allocation17_spill] sm:$0xff] }
 0x2c2   :  { %v2468_v24 = vadd.f32 %v747_v8, %v746_v23  ;;  %v734_v31 = vadd.f32 %v1521_v45, %v733_v7  ;;  %v2941_v7 = vld [vmem:[#allocation7_spill] sm:$0xff]  ;;  %v2942_v8 = vld [vmem:[#allocation8_spill] sm:$0xff]  ;;  %v2955_v23 = vld [vmem:[#allocation18_spill] sm:$0xff] }
 0x2c3   :  { %v2958_v11 = vld [vmem:[#allocation21_spill] sm:$0xff] }
 0x2c4   :  { %1524 = vtanh.f32 %v2468_v24  ;;  %v738_v59 = vsel %vm737_vm14, %v1521_v45, %v734_v31  ;;  %v2939_v45 = vld [vmem:[#allocation6_spill] sm:$0xff]  ;;  %v2956_v31 = vld [vmem:[#allocation29_spill] sm:$0xff] }
 0x2c5   :  { %v743_v15 = vsel %vm740_vm15, %v742_v12, %v738_v59  ;;  %v2959_v59 = vld [vmem:[#allocation22_spill] sm:$0xff] }
 0x2c6   :  { %v2960_v12 = vld [vmem:[#allocation30_spill] sm:$0xff] }
 0x2ca   :  { %v1525_v17 = vpop.eup %1524 }
 0x2cb   :  { %v750_v9 = vmul.f32 %v1525_v17, %v743_v15  ;;  %v2961_v17 = vld [vmem:[#allocation24_spill] sm:$0xff]  ;;  %v2962_v15 = vld [vmem:[#allocation25_spill] sm:$0xff] }
 0x2cd   :  { %1426 = vst [vmem:[%s2702_s5 + $0x18] sm:$0xff] %v750_v9  ;;  %778 = vmatmul.f32.vlgmr.msra.gmra.mxu0 %v750_v9  ;;  %798 = vmatmul.f32.vlgmr.msra.gmra.mxu1 %v750_v9 }
 0x2ce   :  { %818 = vmatmul.f32.vlgmr.msra.gmra.mxu2 %v750_v9  ;;  %838 = vmatmul.f32.vlgmr.msra.gmra.mxu3 %v750_v9  ;;  %v2963_v9 = vld [vmem:[#allocation26_spill] sm:$0xff] }
 0x2cf   :  { %1078 = vmatpush.msra.mxu0 %v2259_v56  ;;  %1098 = vmatpush.msra.mxu1 %v2262_v30 }
 0x2d0   :  { %1118 = vmatpush.msra.mxu2 %v2265_v32  ;;  %1138 = vmatpush.msra.mxu3 %v2268_v33 }
 0x2d1   :  { %1079 = vmatpush.msra.mxu0 %v2271_v34  ;;  %1099 = vmatpush.msra.mxu1 %v2274_v35 }
 0x2d2   :  { %1119 = vmatpush.msra.mxu2 %v2277_v39  ;;  %1139 = vmatpush.msra.mxu3 %v2280_v43 }
 0x2d3   :  { %1080 = vmatpush.msra.mxu0 %v2283_v47  ;;  %1100 = vmatpush.msra.mxu1 %v2286_v51 }
 0x2d4   :  { %1120 = vmatpush.msra.mxu2 %v2289_v36  ;;  %1140 = vmatpush.msra.mxu3 %v2292_v58 }
 0x2d5   :  { %1081 = vmatpush.msra.mxu0 %v2295_v57  ;;  %1101 = vmatpush.msra.mxu1 %v2298_v63 }
 0x2d6   :  { %1121 = vmatpush.msra.mxu2 %v2301_v40  ;;  %1141 = vmatpush.msra.mxu3 %v2304_v42 }
 0x2d7   :  { %1082 = vmatpush.msra.mxu0 %v2307_v55  ;;  %1102 = vmatpush.msra.mxu1 %v2310_v50 }
 0x2d8   :  { %1122 = vmatpush.msra.mxu2 %v2313_v53  ;;  %1142 = vmatpush.msra.mxu3 %v2316_v60 }
 0x2d9   :  { %1083 = vmatpush.msra.mxu0 %v2319_v38  ;;  %1103 = vmatpush.msra.mxu1 %v2322_v54 }
 0x2da   :  { %1123 = vmatpush.msra.mxu2 %v2325_v46  ;;  %1143 = vmatpush.msra.mxu3 %v2328_v61 }
 0x2db   :  { %1084 = vmatpush.msra.mxu0 %v2331_v0  ;;  %1104 = vmatpush.msra.mxu1 %v2334_v41 }
 0x2dc   :  { %1124 = vmatpush.msra.mxu2 %v2337_v44  ;;  %1144 = vmatpush.msra.mxu3 %v2340_v52 }
 0x2dd   :  { %1085 = vmatpush.msra.mxu0 %v2343_v49  ;;  %1105 = vmatpush.msra.mxu1 %v2346_v62 }
 0x2de   :  { %1125 = vmatpush.msra.mxu2 %v2349_v48  ;;  %1145 = vmatpush.msra.mxu3 %v2352_v37 }
 0x2df   :  { %1086 = vmatpush.msra.mxu0 %v2355_v1  ;;  %1106 = vmatpush.msra.mxu1 %v2358_v2 }
 0x2e0   :  { %1126 = vmatpush.msra.mxu2 %v2361_v3  ;;  %1146 = vmatpush.msra.mxu3 %v2364_v4 }
 0x2e1   :  { %1087 = vmatpush.msra.mxu0 %v2367_v5  ;;  %1107 = vmatpush.msra.mxu1 %v2370_v6 }
 0x2e2   :  { %1127 = vmatpush.msra.mxu2 %v2939_v45  ;;  %1147 = vmatpush.msra.mxu3 %v2940_v20 }
 0x2e3   :  { %1088 = vmatpush.msra.mxu0 %v2941_v7  ;;  %1108 = vmatpush.msra.mxu1 %v2942_v8 }
 0x2e4   :  { %1128 = vmatpush.msra.mxu2 %v2943_v10  ;;  %1148 = vmatpush.msra.mxu3 %v2944_v18 }
 0x2e5   :  { %1089 = vmatpush.msra.mxu0 %v2945_v28  ;;  %1109 = vmatpush.msra.mxu1 %v2946_v21 }
 0x2e6   :  { %1129 = vmatpush.msra.mxu2 %v2947_v19  ;;  %1149 = vmatpush.msra.mxu3 %v2948_v22 }
 0x2e7   :  { %1090 = vmatpush.msra.mxu0 %v2949_v25  ;;  %1110 = vmatpush.msra.mxu1 %v2950_v14  ;;  %v2967_v14 = vld [vmem:[#allocation33_spill] sm:$0xff] }
 0x2e8   :  { %1130 = vmatpush.msra.mxu2 %v2951_v16  ;;  %1150 = vmatpush.msra.mxu3 %v2952_v26 }
 0x2e9   :  { %1091 = vmatpush.msra.mxu0 %v2953_v27  ;;  %1111 = vmatpush.msra.mxu1 %v2954_v13  ;;  %v2964_v27 = vld [vmem:[#allocation31_spill] sm:$0xff] }
 0x2ea   :  { %1131 = vmatpush.msra.mxu2 %v2955_v23  ;;  %1151 = vmatpush.msra.mxu3 %v2956_v31  ;;  %v1427_v31 = vld [vmem:[%s2697_s0 + $0x80] sm:$0xff]  ;;  %v2966_v23 = vld [vmem:[#allocation32_spill] sm:$0xff] }
 0x2eb   :  { %1092 = vmatpush.msra.mxu0 %v2957_v29  ;;  %1112 = vmatpush.msra.mxu1 %v2958_v11  ;;  %v1428_v11 = vld [vmem:[%s2697_s0 + $0x88] sm:$0xff]  ;;  %v2965_v29 = vld [vmem:[#allocation5_spill] sm:$0xff] }
 0x2ec   :  { %1132 = vmatpush.msra.mxu2 %v2959_v59  ;;  %1152 = vmatpush.msra.mxu3 %v2960_v12  ;;  %v758_v59 = vadd.f32 %v1427_v31, %v2965_v29  ;;  %v759_v12 = vadd.f32 %v1428_v11, %v2966_v23 }
 0x2ed   :  { %1093 = vmatpush.msra.mxu0 %v2961_v17  ;;  %1113 = vmatpush.msra.mxu1 %v2962_v15 }
 0x2ee   :  { %1133 = vmatpush.msra.mxu2 %v2963_v9  ;;  %1153 = vmatpush.msra.mxu3 %v2964_v27  ;;  %v1429_v27 = vld [vmem:[%s2697_s0 + $0x90] sm:$0xff] }
 0x2ef   :  { %v760_v25 = vadd.f32 %v1429_v27, %v2967_v14 }
 0x34a   :  { %v779_v13 = vpop.f32.mrf.mxu0  ;;  %v799_v17 = vpop.f32.mrf.mxu1 }
 0x34b   :  { %v842_v26 = vadd.f32 %v779_v13, %v758_v59  ;;  %v843_v15 = vadd.f32 %v799_v17, %v759_v12  ;;  %v1430_v13 = vld [vmem:[%s2697_s0 + $0x98] sm:$0xff] }
 0x34d   :  { %v1431_v9 = vmul.f32 -1.442695, %v842_v26  ;;  %v1432_v16 = vmul.f32 -1.442695, %v843_v15  ;;  %v2968_v26 = vld [vmem:[#allocation34_spill] sm:$0xff] }
 0x34e   :  { %v761_v59 = vadd.f32 %v1430_v13, %v2968_v26 }
 0x34f   :  { %1526 = vpow2.f32 %v1431_v9 }
 0x350   :  { %1528 = vpow2.f32 %v1432_v16 }
 0x351   :  { %v819_v22 = vpop.f32.mrf.mxu2  ;;  %v839_v12 = vpop.f32.mrf.mxu3 }
 0x352   :  { %v844_v19 = vadd.f32 %v819_v22, %v760_v25  ;;  %v845_v15 = vadd.f32 %v839_v12, %v761_v59 }
 0x354   :  { %v1433_v21 = vmul.f32 -1.442695, %v844_v19 }
 0x355   :  { %v1527_v31 = vpop.eup %1526 }
 0x356   :  { %v1529_v29 = vpop.eup %1528  ;;  %v855_v11 = vadd.f32 1.0, %v1527_v31  ;;  %1530 = vpow2.f32 %v1433_v21 }
 0x357   :  { %v856_v23 = vadd.f32 1.0, %v1529_v29 }
 0x358   :  { %1532 = vrcp.f32 %v855_v11  ;;  %v869_v29 = vand.u32 2147483648, %v855_v11  ;;  %v867_v28 = vand.u32 2147483647, %v855_v11  ;;  %vm863_vm2 = vweird.f32 %v855_v11 }
 0x359   :  { %1534 = vrcp.f32 %v856_v23  ;;  %v884_v31 = vand.u32 2147483648, %v856_v23  ;;  %v882_v13 = vand.u32 2147483647, %v856_v23  ;;  %vm878_vm3 = vweird.f32 %v856_v23 }
 0x35a   :  { %v870_v12 = vor.u32 1.1754944e-38, %v869_v29  ;;  %vm868_vm6 = vcmp.eq.f32.partialorder %v867_v28, 8.507059e+37 }
 0x35b   :  { %vm883_vm7 = vcmp.eq.f32.partialorder %v882_v13, 8.507059e+37 }
 0x35c   :  { %v1531_v27 = vpop.eup %1530 }
 0x35d   :  { %v857_v17 = vadd.f32 1.0, %v1531_v27 }
 0x35e   :  { %v1533_v16 = vpop.eup %1532 }
 0x35f   :  { %v1535_v22 = vpop.eup %1534  ;;  %v859_v19 = vmul.f32 %v1533_v16, %v855_v11  ;;  %1536 = vrcp.f32 %v857_v17  ;;  %vm864_vm0 = vweird.f32 %v1533_v16  ;;  %v899_v29 = vand.u32 2147483648, %v857_v17 }
 0x360   :  { %v874_v25 = vmul.f32 %v1535_v22, %v856_v23  ;;  %1538 = vtanh.f32 %v845_v15  ;;  %vm879_vm1 = vweird.f32 %v1535_v22  ;;  %vm865_vm4 = vmor %vm863_vm2, %vm864_vm0  ;;  %vm893_vm9 = vweird.f32 %v857_v17 }
 0x361   :  { %v860_v9 = vsub.f32 1.0, %v859_v19  ;;  %vm880_vm5 = vmor %vm878_vm3, %vm879_vm1  ;;  %v885_v19 = vor.u32 1.1754944e-38, %v884_v31  ;;  %v900_v28 = vor.u32 1.1754944e-38, %v899_v29 }
 0x362   :  { %v875_v21 = vsub.f32 1.0, %v874_v25 }
 0x363   :  { %v861_v14 = vmul.f32 %v1533_v16, %v860_v9 }
 0x364   :  { %v876_v18 = vmul.f32 %v1535_v22, %v875_v21 }
 0x365   :  { %v1537_v26 = vpop.eup %1536  ;;  %v862_v10 = vadd.f32 %v1533_v16, %v861_v14 }
 0x366   :  { %v889_v59 = vmul.f32 %v1537_v26, %v857_v17  ;;  %v877_v27 = vadd.f32 %v1535_v22, %v876_v18  ;;  %v1539_v15 = vpop.eup %1538  ;;  %vm894_vm8 = vweird.f32 %v1537_v26 }
 0x367   :  { %v866_v25 = vsel %vm865_vm4, %v1533_v16, %v862_v10  ;;  %v897_v10 = vand.u32 2147483647, %v857_v17  ;;  %vm895_vm10 = vmor %vm893_vm9, %vm894_vm8 }
 0x368   :  { %v890_v8 = vsub.f32 1.0, %v889_v59  ;;  %v871_v9 = vsel %vm868_vm6, %v870_v12, %v866_v25  ;;  %v881_v7 = vsel %vm880_vm5, %v1535_v22, %v877_v27  ;;  %v1438_v27 = vld [vmem:[%s2697_s0 + $0xb8] sm:$0xff] }
 0x369   :  { %v886_v21 = vsel %vm883_vm7, %v885_v19, %v881_v7  ;;  %v905_v20 = vmul.f32 %v1539_v15, %v871_v9  ;;  %vm898_vm11 = vcmp.eq.f32.partialorder %v897_v10, 8.507059e+37  ;;  %v2998_v19 = vld [vmem:[#allocation34_spill] sm:$0xff] }
 0x36a   :  { %v891_v45 = vmul.f32 %v1537_v26, %v890_v8  ;;  %v904_v14 = vmul.f32 %v886_v21, %v2468_v24  ;;  %v919_v25 = vadd.f32 %v1438_v27, %v2998_v19 }
 0x36c   :  { %v2555_v11 = vadd.f32 %v905_v20, %v904_v14  ;;  %v892_v23 = vadd.f32 %v1537_v26, %v891_v45  ;;  %v2997_v45 = vld [vmem:[#allocation33_spill] sm:$0xff] }
 0x36e   :  { %1540 = vtanh.f32 %v2555_v11  ;;  %v896_v18 = vsel %vm895_vm10, %v1537_v26, %v892_v23 }
 0x36f   :  { %v901_v22 = vsel %vm898_vm11, %v900_v28, %v896_v18 }
 0x374   :  { %v1541_v16 = vpop.eup %1540 }
 0x375   :  { %v908_v7 = vmul.f32 %v1541_v16, %v901_v22 }
 0x377   :  { %1434 = vst [vmem:[%s2702_s5 + $0x20] sm:$0xff] %v908_v7  ;;  %936 = vmatmul.f32.vlgmr.msrb.gmra.mxu0 %v908_v7  ;;  %956 = vmatmul.f32.vlgmr.msrb.gmra.mxu1 %v908_v7 }
 0x378   :  { %976 = vmatmul.f32.vlgmr.msrb.gmra.mxu2 %v908_v7  ;;  %996 = vmatmul.f32.vlgmr.msrb.gmra.mxu3 %v908_v7 }
 0x379   :  { %1236 = vmatpush.msrb.mxu0 %v2259_v56  ;;  %1256 = vmatpush.msrb.mxu1 %v2262_v30  ;;  %v2969_v56 = vld [vmem:[#allocation6_spill] sm:$0xff]  ;;  %v2970_v30 = vld [vmem:[#allocation19_spill] sm:$0xff] }
 0x37a   :  { %1276 = vmatpush.msrb.mxu2 %v2265_v32  ;;  %1296 = vmatpush.msrb.mxu3 %v2268_v33  ;;  %v2971_v32 = vld [vmem:[#allocation7_spill] sm:$0xff]  ;;  %v2972_v33 = vld [vmem:[#allocation8_spill] sm:$0xff] }
 0x37b   :  { %1237 = vmatpush.msrb.mxu0 %v2271_v34  ;;  %1257 = vmatpush.msrb.mxu1 %v2274_v35  ;;  %v2973_v34 = vld [vmem:[#allocation9_spill] sm:$0xff]  ;;  %v2974_v35 = vld [vmem:[#allocation23_spill] sm:$0xff] }
 0x37c   :  { %1277 = vmatpush.msrb.mxu2 %v2277_v39  ;;  %1297 = vmatpush.msrb.mxu3 %v2280_v43  ;;  %v2975_v39 = vld [vmem:[#allocation10_spill] sm:$0xff]  ;;  %v2976_v43 = vld [vmem:[#allocation11_spill] sm:$0xff] }
 0x37d   :  { %1238 = vmatpush.msrb.mxu0 %v2283_v47  ;;  %1258 = vmatpush.msrb.mxu1 %v2286_v51  ;;  %v2977_v47 = vld [vmem:[#allocation12_spill] sm:$0xff]  ;;  %v2978_v51 = vld [vmem:[#allocation27_spill] sm:$0xff] }
 0x37e   :  { %1278 = vmatpush.msrb.mxu2 %v2289_v36  ;;  %1298 = vmatpush.msrb.mxu3 %v2292_v58  ;;  %v2979_v36 = vld [vmem:[#allocation13_spill] sm:$0xff]  ;;  %v2980_v58 = vld [vmem:[#allocation14_spill] sm:$0xff] }
 0x37f   :  { %1239 = vmatpush.msrb.mxu0 %v2295_v57  ;;  %1259 = vmatpush.msrb.mxu1 %v2298_v63  ;;  %v2981_v57 = vld [vmem:[#allocation15_spill] sm:$0xff]  ;;  %v2982_v63 = vld [vmem:[#allocation28_spill] sm:$0xff] }
 0x380   :  { %1279 = vmatpush.msrb.mxu2 %v2301_v40  ;;  %1299 = vmatpush.msrb.mxu3 %v2304_v42  ;;  %v2983_v40 = vld [vmem:[#allocation16_spill] sm:$0xff]  ;;  %v2984_v42 = vld [vmem:[#allocation17_spill] sm:$0xff] }
 0x381   :  { %1240 = vmatpush.msrb.mxu0 %v2307_v55  ;;  %1260 = vmatpush.msrb.mxu1 %v2310_v50  ;;  %v2985_v55 = vld [vmem:[#allocation18_spill] sm:$0xff]  ;;  %v2986_v50 = vld [vmem:[#allocation29_spill] sm:$0xff] }
 0x382   :  { %1280 = vmatpush.msrb.mxu2 %v2313_v53  ;;  %1300 = vmatpush.msrb.mxu3 %v2316_v60  ;;  %v2987_v53 = vld [vmem:[#allocation20_spill] sm:$0xff]  ;;  %v2988_v60 = vld [vmem:[#allocation21_spill] sm:$0xff] }
 0x383   :  { %1241 = vmatpush.msrb.mxu0 %v2319_v38  ;;  %1261 = vmatpush.msrb.mxu1 %v2322_v54  ;;  %v2989_v38 = vld [vmem:[#allocation22_spill] sm:$0xff] }
 0x384   :  { %1281 = vmatpush.msrb.mxu2 %v2325_v46  ;;  %1301 = vmatpush.msrb.mxu3 %v2328_v61  ;;  %v2990_v54 = vld [vmem:[#allocation30_spill] sm:$0xff]  ;;  %v2991_v46 = vld [vmem:[#allocation24_spill] sm:$0xff]  ;;  %v2992_v61 = vld [vmem:[#allocation25_spill] sm:$0xff] }
 0x385   :  { %1242 = vmatpush.msrb.mxu0 %v2331_v0  ;;  %1262 = vmatpush.msrb.mxu1 %v2334_v41  ;;  %v2993_v0 = vld [vmem:[#allocation26_spill] sm:$0xff]  ;;  %v2994_v41 = vld [vmem:[#allocation31_spill] sm:$0xff] }
 0x386   :  { %1282 = vmatpush.msrb.mxu2 %v2337_v44  ;;  %1302 = vmatpush.msrb.mxu3 %v2340_v52  ;;  %v1435_v44 = vld [vmem:[%s2697_s0 + $0xa0] sm:$0xff]  ;;  %v1436_v52 = vld [vmem:[%s2697_s0 + $0xa8] sm:$0xff] }
 0x387   :  { %1243 = vmatpush.msrb.mxu0 %v2343_v49  ;;  %1263 = vmatpush.msrb.mxu1 %v2346_v62  ;;  %v2995_v49 = vld [vmem:[#allocation5_spill] sm:$0xff] }
 0x388   :  { %1283 = vmatpush.msrb.mxu2 %v2349_v48  ;;  %1303 = vmatpush.msrb.mxu3 %v2352_v37  ;;  %v916_v62 = vadd.f32 %v1435_v44, %v2995_v49  ;;  %v2996_v48 = vld [vmem:[#allocation32_spill] sm:$0xff] }
 0x389   :  { %1244 = vmatpush.msrb.mxu0 %v2355_v1  ;;  %1264 = vmatpush.msrb.mxu1 %v2358_v2  ;;  %v917_v37 = vadd.f32 %v1436_v52, %v2996_v48 }
 0x38a   :  { %1284 = vmatpush.msrb.mxu2 %v2361_v3  ;;  %1304 = vmatpush.msrb.mxu3 %v2364_v4 }
 0x38b   :  { %1245 = vmatpush.msrb.mxu0 %v2367_v5  ;;  %1265 = vmatpush.msrb.mxu1 %v2370_v6  ;;  %v1437_v5 = vld [vmem:[%s2697_s0 + $0xb0] sm:$0xff] }
 0x38c   :  { %1285 = vmatpush.msrb.mxu2 %v2969_v56  ;;  %1305 = vmatpush.msrb.mxu3 %v2970_v30  ;;  %v918_v20 = vadd.f32 %v1437_v5, %v2997_v45 }
 0x38d   :  { %1246 = vmatpush.msrb.mxu0 %v2971_v32  ;;  %1266 = vmatpush.msrb.mxu1 %v2972_v33 }
 0x38e   :  { %1286 = vmatpush.msrb.mxu2 %v2973_v34  ;;  %1306 = vmatpush.msrb.mxu3 %v2974_v35 }
 0x38f   :  { %1247 = vmatpush.msrb.mxu0 %v2975_v39  ;;  %1267 = vmatpush.msrb.mxu1 %v2976_v43 }
 0x390   :  { %1287 = vmatpush.msrb.mxu2 %v2977_v47  ;;  %1307 = vmatpush.msrb.mxu3 %v2978_v51 }
 0x391   :  { %1248 = vmatpush.msrb.mxu0 %v2979_v36  ;;  %1268 = vmatpush.msrb.mxu1 %v2980_v58 }
 0x392   :  { %1288 = vmatpush.msrb.mxu2 %v2981_v57  ;;  %1308 = vmatpush.msrb.mxu3 %v2982_v63 }
 0x393   :  { %1249 = vmatpush.msrb.mxu0 %v2983_v40  ;;  %1269 = vmatpush.msrb.mxu1 %v2984_v42 }
 0x394   :  { %1289 = vmatpush.msrb.mxu2 %v2985_v55  ;;  %1309 = vmatpush.msrb.mxu3 %v2986_v50 }
 0x395   :  { %1250 = vmatpush.msrb.mxu0 %v2987_v53  ;;  %1270 = vmatpush.msrb.mxu1 %v2988_v60 }
 0x396   :  { %1290 = vmatpush.msrb.mxu2 %v2989_v38  ;;  %1310 = vmatpush.msrb.mxu3 %v2990_v54 }
 0x397   :  { %1251 = vmatpush.msrb.mxu0 %v2991_v46  ;;  %1271 = vmatpush.msrb.mxu1 %v2992_v61 }
 0x398   :  { %1291 = vmatpush.msrb.mxu2 %v2993_v0  ;;  %1311 = vmatpush.msrb.mxu3 %v2994_v41 }
 0x3f4   :  { %v937_v1 = vpop.f32.mrf.mxu0  ;;  %v957_v2 = vpop.f32.mrf.mxu1 }
 0x3f5   :  { %v1000_v3 = vadd.f32 %v937_v1, %v916_v62  ;;  %v1001_v4 = vadd.f32 %v957_v2, %v917_v37  ;;  %v1444_v62 = vld [vmem:[%s2697_s0 + $0xc8] sm:$0xff] }
 0x3f6   :  { %v1075_v1 = vadd.f32 %v1444_v62, %v2996_v48 }
 0x3f7   :  { %v1439_v6 = vmul.f32 -1.442695, %v1000_v3  ;;  %v1440_v24 = vmul.f32 -1.442695, %v1001_v4 }
 0x3f9   :  { %1542 = vpow2.f32 %v1439_v6  ;;  %v1445_v6 = vld [vmem:[%s2697_s0 + $0xd0] sm:$0xff] }
 0x3fa   :  { %1544 = vpow2.f32 %v1440_v24 }
 0x3fb   :  { %v977_v8 = vpop.f32.mrf.mxu2  ;;  %v997_v15 = vpop.f32.mrf.mxu3 }
 0x3fc   :  { %v1002_v26 = vadd.f32 %v977_v8, %v918_v20  ;;  %v1003_v23 = vadd.f32 %v997_v15, %v919_v25  ;;  %v1076_v8 = vadd.f32 %v1445_v6, %v2997_v45  ;;  %v1446_v25 = vld [vmem:[%s2697_s0 + $0xd8] sm:$0xff] }
 0x3fd   :  { %v1077_v15 = vadd.f32 %v1446_v25, %v2998_v19 }
 0x3fe   :  { %v1441_v17 = vmul.f32 -1.442695, %v1002_v26 }
 0x3ff   :  { %v1543_v31 = vpop.eup %1542 }
 0x400   :  { %v1545_v13 = vpop.eup %1544  ;;  %v1013_v59 = vadd.f32 1.0, %v1543_v31  ;;  %1546 = vpow2.f32 %v1441_v17 }
 0x401   :  { %v1014_v12 = vadd.f32 1.0, %v1545_v13 }
 0x402   :  { %1548 = vrcp.f32 %v1013_v59  ;;  %v1027_v22 = vand.u32 2147483648, %v1013_v59  ;;  %v1025_v30 = vand.u32 2147483647, %v1013_v59  ;;  %vm1021_vm14 = vweird.f32 %v1013_v59 }
 0x403   :  { %1550 = vrcp.f32 %v1014_v12  ;;  %v1042_v7 = vand.u32 2147483648, %v1014_v12  ;;  %v1040_v33 = vand.u32 2147483647, %v1014_v12  ;;  %vm1036_vm15 = vweird.f32 %v1014_v12 }
 0x404   :  { %v1028_v43 = vor.u32 1.1754944e-38, %v1027_v22  ;;  %vm1026_vm2 = vcmp.eq.f32.partialorder %v1025_v30, 8.507059e+37 }
 0x405   :  { %v1043_v51 = vor.u32 1.1754944e-38, %v1042_v7  ;;  %vm1041_vm3 = vcmp.eq.f32.partialorder %v1040_v33, 8.507059e+37 }
 0x406   :  { %v1547_v9 = vpop.eup %1546 }
 0x407   :  { %v1015_v21 = vadd.f32 1.0, %v1547_v9 }
 0x408   :  { %v1549_v14 = vpop.eup %1548 }
 0x409   :  { %v1551_v29 = vpop.eup %1550  ;;  %v1017_v10 = vmul.f32 %v1549_v14, %v1013_v59  ;;  %1552 = vrcp.f32 %v1015_v21  ;;  %vm1022_vm12 = vweird.f32 %v1549_v14  ;;  %v1057_v54 = vand.u32 2147483648, %v1015_v21 }
 0x40a   :  { %v1032_v18 = vmul.f32 %v1551_v29, %v1014_v12  ;;  %1554 = vtanh.f32 %v1003_v23  ;;  %vm1037_vm13 = vweird.f32 %v1551_v29  ;;  %vm1023_vm0 = vmor %vm1021_vm14, %vm1022_vm12  ;;  %vm1051_vm5 = vweird.f32 %v1015_v21 }
 0x40b   :  { %v1018_v28 = vsub.f32 1.0, %v1017_v10  ;;  %vm1038_vm1 = vmor %vm1036_vm15, %vm1037_vm13  ;;  %v1055_v46 = vand.u32 2147483647, %v1015_v21  ;;  %v1058_v0 = vor.u32 1.1754944e-38, %v1057_v54 }
 0x40c   :  { %v1033_v16 = vsub.f32 1.0, %v1032_v18 }
 0x40d   :  { %v1019_v56 = vmul.f32 %v1549_v14, %v1018_v28  ;;  %vm1056_vm7 = vcmp.eq.f32.partialorder %v1055_v46, 8.507059e+37 }
 0x40e   :  { %v1034_v32 = vmul.f32 %v1551_v29, %v1033_v16 }
 0x40f   :  { %v1553_v34 = vpop.eup %1552  ;;  %v1020_v35 = vadd.f32 %v1549_v14, %v1019_v56 }
 0x410   :  { %v1047_v39 = vmul.f32 %v1553_v34, %v1015_v21  ;;  %v1035_v47 = vadd.f32 %v1551_v29, %v1034_v32  ;;  %v1555_v58 = vpop.eup %1554  ;;  %vm1052_vm4 = vweird.f32 %v1553_v34 }
 0x411   :  { %v1024_v36 = vsel %vm1023_vm0, %v1549_v14, %v1020_v35  ;;  %vm1053_vm6 = vmor %vm1051_vm5, %vm1052_vm4 }
 0x412   :  { %v1048_v57 = vsub.f32 1.0, %v1047_v39  ;;  %v1029_v63 = vsel %vm1026_vm2, %v1028_v43, %v1024_v36  ;;  %v1039_v40 = vsel %vm1038_vm1, %v1551_v29, %v1035_v47 }
 0x413   :  { %v1044_v42 = vsel %vm1041_vm3, %v1043_v51, %v1039_v40  ;;  %v1063_v55 = vmul.f32 %v1555_v58, %v1029_v63 }
 0x414   :  { %v1049_v50 = vmul.f32 %v1553_v34, %v1048_v57  ;;  %v1062_v53 = vmul.f32 %v1044_v42, %v2555_v11  ;;  %v1443_v11 = vld [vmem:[%s2697_s0 + $0xc0] sm:$0xff] }
 0x415   :  { %v1074_v37 = vadd.f32 %v1443_v11, %v2995_v49 }
 0x416   :  { %v2642_v60 = vadd.f32 %v1063_v55, %v1062_v53  ;;  %v1050_v38 = vadd.f32 %v1553_v34, %v1049_v50 }
 0x418   :  { %1556 = vtanh.f32 %v2642_v60  ;;  %v1054_v61 = vsel %vm1053_vm6, %v1553_v34, %v1050_v38 }
 0x419   :  { %v1059_v44 = vsel %vm1056_vm7, %v1058_v0, %v1054_v61 }
 0x41e   :  { %v1557_v41 = vpop.eup %1556 }
 0x41f   :  { %v1066_v52 = vmul.f32 %v1557_v41, %v1059_v44 }
 0x421   :  { %1442 = vst [vmem:[%s2702_s5 + $0x28] sm:$0xff] %v1066_v52  ;;  %1094 = vmatmul.f32.vlgmr.msra.gmra.mxu0 %v1066_v52  ;;  %1114 = vmatmul.f32.vlgmr.msra.gmra.mxu1 %v1066_v52 }
 0x422   :  { %1134 = vmatmul.f32.vlgmr.msra.gmra.mxu2 %v1066_v52  ;;  %1154 = vmatmul.f32.vlgmr.msra.gmra.mxu3 %v1066_v52 }
 0x49e   :  { %v1095_v2 = vpop.f32.mrf.mxu0  ;;  %v1115_v3 = vpop.f32.mrf.mxu1 }
 0x49f   :  { %v1158_v4 = vadd.f32 %v1095_v2, %v1074_v37  ;;  %v1159_v5 = vadd.f32 %v1115_v3, %v1075_v1  ;;  %v1452_v37 = vld [vmem:[%s2697_s0 + $0xe8] sm:$0xff] }
 0x4a0   :  { %v1233_v2 = vadd.f32 %v1452_v37, %v2996_v48 }
 0x4a1   :  { %v1447_v24 = vmul.f32 -1.442695, %v1158_v4  ;;  %v1448_v20 = vmul.f32 -1.442695, %v1159_v5 }
 0x4a3   :  { %1558 = vpow2.f32 %v1447_v24  ;;  %v1453_v24 = vld [vmem:[%s2697_s0 + $0xf0] sm:$0xff] }
 0x4a4   :  { %1560 = vpow2.f32 %v1448_v20 }
 0x4a5   :  { %v1135_v26 = vpop.f32.mrf.mxu2  ;;  %v1155_v9 = vpop.f32.mrf.mxu3 }
 0x4a6   :  { %v1160_v17 = vadd.f32 %v1135_v26, %v1076_v8  ;;  %v1161_v29 = vadd.f32 %v1155_v9, %v1077_v15  ;;  %v1234_v26 = vadd.f32 %v1453_v24, %v2997_v45 }
 0x4a8   :  { %v1449_v31 = vmul.f32 -1.442695, %v1160_v17 }
 0x4a9   :  { %v1559_v13 = vpop.eup %1558 }
 0x4aa   :  { %v1561_v59 = vpop.eup %1560  ;;  %v1171_v12 = vadd.f32 1.0, %v1559_v13  ;;  %1562 = vpow2.f32 %v1449_v31 }
 0x4ab   :  { %v1172_v27 = vadd.f32 1.0, %v1561_v59 }
 0x4ac   :  { %1564 = vrcp.f32 %v1171_v12  ;;  %v1185_v7 = vand.u32 2147483648, %v1171_v12  ;;  %v1183_v32 = vand.u32 2147483647, %v1171_v12  ;;  %vm1179_vm10 = vweird.f32 %v1171_v12 }
 0x4ad   :  { %1566 = vrcp.f32 %v1172_v27  ;;  %v1200_v56 = vand.u32 2147483648, %v1172_v27  ;;  %v1198_v34 = vand.u32 2147483647, %v1172_v27  ;;  %vm1194_vm11 = vweird.f32 %v1172_v27 }
 0x4ae   :  { %v1186_v47 = vor.u32 1.1754944e-38, %v1185_v7  ;;  %vm1184_vm14 = vcmp.eq.f32.partialorder %v1183_v32, 8.507059e+37 }
 0x4af   :  { %v1201_v36 = vor.u32 1.1754944e-38, %v1200_v56  ;;  %vm1199_vm15 = vcmp.eq.f32.partialorder %v1198_v34, 8.507059e+37 }
 0x4b0   :  { %v1563_v21 = vpop.eup %1562 }
 0x4b1   :  { %v1173_v14 = vadd.f32 1.0, %v1563_v21 }
 0x4b2   :  { %v1565_v23 = vpop.eup %1564 }
 0x4b3   :  { %v1567_v10 = vpop.eup %1566  ;;  %v1175_v18 = vmul.f32 %v1565_v23, %v1171_v12  ;;  %1568 = vrcp.f32 %v1173_v14  ;;  %vm1180_vm8 = vweird.f32 %v1565_v23  ;;  %v1215_v61 = vand.u32 2147483648, %v1173_v14 }
 0x4b4   :  { %v1190_v28 = vmul.f32 %v1567_v10, %v1172_v27  ;;  %1570 = vtanh.f32 %v1161_v29  ;;  %vm1195_vm9 = vweird.f32 %v1567_v10  ;;  %vm1181_vm12 = vmor %vm1179_vm10, %vm1180_vm8  ;;  %vm1209_vm1 = vweird.f32 %v1173_v14  ;;  %v1454_v27 = vld [vmem:[%s2697_s0 + $0xf8] sm:$0xff] }
 0x4b5   :  { %v1176_v16 = vsub.f32 1.0, %v1175_v18  ;;  %vm1196_vm13 = vmor %vm1194_vm11, %vm1195_vm9  ;;  %v1213_v0 = vand.u32 2147483647, %v1173_v14  ;;  %v1216_v44 = vor.u32 1.1754944e-38, %v1215_v61  ;;  %v1235_v25 = vadd.f32 %v1454_v27, %v2998_v19 }
 0x4b6   :  { %v1191_v22 = vsub.f32 1.0, %v1190_v28 }
 0x4b7   :  { %v1177_v30 = vmul.f32 %v1565_v23, %v1176_v16  ;;  %vm1214_vm3 = vcmp.eq.f32.partialorder %v1213_v0, 8.507059e+37 }
 0x4b8   :  { %v1192_v33 = vmul.f32 %v1567_v10, %v1191_v22 }
 0x4b9   :  { %v1569_v35 = vpop.eup %1568  ;;  %v1178_v39 = vadd.f32 %v1565_v23, %v1177_v30 }
 0x4ba   :  { %v1205_v43 = vmul.f32 %v1569_v35, %v1173_v14  ;;  %v1193_v51 = vadd.f32 %v1567_v10, %v1192_v33  ;;  %v1571_v57 = vpop.eup %1570  ;;  %vm1210_vm0 = vweird.f32 %v1569_v35 }
 0x4bb   :  { %v1182_v58 = vsel %vm1181_vm12, %v1565_v23, %v1178_v39  ;;  %vm1211_vm2 = vmor %vm1209_vm1, %vm1210_vm0 }
 0x4bc   :  { %v1206_v63 = vsub.f32 1.0, %v1205_v43  ;;  %v1187_v40 = vsel %vm1184_vm14, %v1186_v47, %v1182_v58  ;;  %v1197_v42 = vsel %vm1196_vm13, %v1567_v10, %v1193_v51 }
 0x4bd   :  { %v1202_v55 = vsel %vm1199_vm15, %v1201_v36, %v1197_v42  ;;  %v1221_v50 = vmul.f32 %v1571_v57, %v1187_v40 }
 0x4be   :  { %v1207_v53 = vmul.f32 %v1569_v35, %v1206_v63  ;;  %v1220_v38 = vmul.f32 %v1202_v55, %v2642_v60  ;;  %v1451_v60 = vld [vmem:[%s2697_s0 + $0xe0] sm:$0xff] }
 0x4bf   :  { %v1232_v1 = vadd.f32 %v1451_v60, %v2995_v49 }
 0x4c0   :  { %v2665_v54 = vadd.f32 %v1221_v50, %v1220_v38  ;;  %v1208_v46 = vadd.f32 %v1569_v35, %v1207_v53 }
 0x4c2   :  { %1572 = vtanh.f32 %v2665_v54  ;;  %v1212_v41 = vsel %vm1211_vm2, %v1569_v35, %v1208_v46 }
 0x4c3   :  { %v1217_v11 = vsel %vm1214_vm3, %v1216_v44, %v1212_v41 }
 0x4c8   :  { %v1573_v52 = vpop.eup %1572 }
 0x4c9   :  { %v1224_v62 = vmul.f32 %v1573_v52, %v1217_v11 }
 0x4cb   :  { %1450 = vst [vmem:[%s2702_s5 + $0x30] sm:$0xff] %v1224_v62  ;;  %1252 = vmatmul.f32.vlgmr.msrb.gmra.mxu0 %v1224_v62  ;;  %1272 = vmatmul.f32.vlgmr.msrb.gmra.mxu1 %v1224_v62 }
 0x4cc   :  { %1292 = vmatmul.f32.vlgmr.msrb.gmra.mxu2 %v1224_v62  ;;  %1312 = vmatmul.f32.vlgmr.msrb.gmra.mxu3 %v1224_v62 }
 0x548   :  { %v1253_v3 = vpop.f32.mrf.mxu0  ;;  %v1273_v4 = vpop.f32.mrf.mxu1 }
 0x549   :  { %v1316_v5 = vadd.f32 %v1253_v3, %v1232_v1  ;;  %v1317_v6 = vadd.f32 %v1273_v4, %v1233_v2 }
 0x54b   :  { %v1455_v20 = vmul.f32 -1.442695, %v1316_v5  ;;  %v1456_v8 = vmul.f32 -1.442695, %v1317_v6 }
 0x54d   :  { %1574 = vpow2.f32 %v1455_v20 }
 0x54e   :  { %1576 = vpow2.f32 %v1456_v8 }
 0x54f   :  { %v1293_v17 = vpop.f32.mrf.mxu2  ;;  %v1313_v15 = vpop.f32.mrf.mxu3 }
 0x550   :  { %v1318_v31 = vadd.f32 %v1293_v17, %v1234_v26  ;;  %v1319_v14 = vadd.f32 %v1313_v15, %v1235_v25 }
 0x552   :  { %v1457_v13 = vmul.f32 -1.442695, %v1318_v31 }
 0x553   :  { %v1575_v49 = vpop.eup %1574 }
 0x554   :  { %v1577_v59 = vpop.eup %1576  ;;  %v1329_v48 = vadd.f32 1.0, %v1575_v49  ;;  %1578 = vpow2.f32 %v1457_v13 }
 0x555   :  { %v1330_v12 = vadd.f32 1.0, %v1577_v59 }
 0x556   :  { %1580 = vrcp.f32 %v1329_v48  ;;  %v1343_v16 = vand.u32 2147483648, %v1329_v48  ;;  %v1341_v56 = vand.u32 2147483647, %v1329_v48  ;;  %vm1337_vm6 = vweird.f32 %v1329_v48 }
 0x557   :  { %1582 = vrcp.f32 %v1330_v12  ;;  %v1358_v22 = vand.u32 2147483648, %v1330_v12  ;;  %v1356_v19 = vand.u32 2147483647, %v1330_v12  ;;  %vm1352_vm7 = vweird.f32 %v1330_v12 }
 0x558   :  { %v1344_v35 = vor.u32 1.1754944e-38, %v1343_v16  ;;  %vm1342_vm10 = vcmp.eq.f32.partialorder %v1341_v56, 8.507059e+37 }
 0x559   :  { %v1359_v43 = vor.u32 1.1754944e-38, %v1358_v22  ;;  %vm1357_vm11 = vcmp.eq.f32.partialorder %v1356_v19, 8.507059e+37 }
 0x55a   :  { %v1579_v45 = vpop.eup %1578 }
 0x55b   :  { %v1331_v9 = vadd.f32 1.0, %v1579_v45 }
 0x55c   :  { %v1581_v21 = vpop.eup %1580 }
 0x55d   :  { %v1583_v23 = vpop.eup %1582  ;;  %v1333_v29 = vmul.f32 %v1581_v21, %v1329_v48  ;;  %1584 = vrcp.f32 %v1331_v9  ;;  %vm1338_vm4 = vweird.f32 %v1581_v21  ;;  %v1373_v38 = vand.u32 2147483648, %v1331_v9 }
 0x55e   :  { %v1348_v10 = vmul.f32 %v1583_v23, %v1330_v12  ;;  %1586 = vtanh.f32 %v1319_v14  ;;  %vm1353_vm5 = vweird.f32 %v1583_v23  ;;  %vm1339_vm8 = vmor %vm1337_vm6, %vm1338_vm4  ;;  %vm1367_vm13 = vweird.f32 %v1331_v9 }
 0x55f   :  { %v1334_v18 = vsub.f32 1.0, %v1333_v29  ;;  %vm1354_vm9 = vmor %vm1352_vm7, %vm1353_vm5  ;;  %v1371_v46 = vand.u32 2147483647, %v1331_v9  ;;  %v1374_v0 = vor.u32 1.1754944e-38, %v1373_v38 }
 0x560   :  { %v1349_v28 = vsub.f32 1.0, %v1348_v10 }
 0x561   :  { %v1335_v7 = vmul.f32 %v1581_v21, %v1334_v18  ;;  %vm1372_vm15 = vcmp.eq.f32.partialorder %v1371_v46, 8.507059e+37 }
 0x562   :  { %v1350_v30 = vmul.f32 %v1583_v23, %v1349_v28 }
 0x563   :  { %v1585_v32 = vpop.eup %1584  ;;  %v1336_v33 = vadd.f32 %v1581_v21, %v1335_v7 }
 0x564   :  { %v1363_v34 = vmul.f32 %v1585_v32, %v1331_v9  ;;  %v1351_v39 = vadd.f32 %v1583_v23, %v1350_v30  ;;  %v1587_v51 = vpop.eup %1586  ;;  %vm1368_vm12 = vweird.f32 %v1585_v32 }
 0x565   :  { %v1340_v47 = vsel %vm1339_vm8, %v1581_v21, %v1336_v33  ;;  %vm1369_vm14 = vmor %vm1367_vm13, %vm1368_vm12 }
 0x566   :  { %v1364_v36 = vsub.f32 1.0, %v1363_v34  ;;  %v1345_v58 = vsel %vm1342_vm10, %v1344_v35, %v1340_v47  ;;  %v1355_v57 = vsel %vm1354_vm9, %v1583_v23, %v1351_v39 }
 0x567   :  { %v1360_v63 = vsel %vm1357_vm11, %v1359_v43, %v1355_v57  ;;  %v1379_v40 = vmul.f32 %v1587_v51, %v1345_v58 }
 0x568   :  { %v1365_v42 = vmul.f32 %v1585_v32, %v1364_v36  ;;  %v1378_v55 = vmul.f32 %v1360_v63, %v2665_v54 }
 0x56a   :  { %v1380_v50 = vadd.f32 %v1379_v40, %v1378_v55  ;;  %v1366_v53 = vadd.f32 %v1585_v32, %v1365_v42 }
 0x56c   :  { %1588 = vtanh.f32 %v1380_v50  ;;  %1386 = vst [vmem:[%s2704_s7] sm:$0xff] %v1380_v50  ;;  %v1370_v61 = vsel %vm1369_vm14, %v1585_v32, %v1366_v53 }
 0x56d   :  { %v1375_v44 = vsel %vm1372_vm15, %v1374_v0, %v1370_v61 }
 0x572   :  { %v1589_v41 = vpop.eup %1588 }
 0x573   :  { %v1382_v52 = vmul.f32 %v1589_v41, %v1375_v44 }
 0x575   :  { %1458 = vst [vmem:[%s2702_s5 + $0x38] sm:$0xff] %v1382_v52 }
 0x576   :  { %1385 = vst [vmem:[%s2703_s6] sm:$0xff] %v1382_v52 }
 0x577   :  { %1399 = vsyncpa [#allocation3], 1 }

</bundles_post_ra>
